<compile_context>
chip_gen: v7x
topology: tpu7x:2x2x1
jax: 0.10.0
libtpu: 0.0.40
codegen_flags: <defaults>
</compile_context>

<pallas_src>
import functools

import jax
import jax.numpy as jnp
from jax import lax
from jax.experimental import pallas as pl
from jax.experimental.pallas import tpu as pltpu  # noqa: F401  (no scratch needed at this size)

# ---- module hyper-parameters (small, consistent with the module) ----
N_GAUSSIAN = 20
RNN_SIZE = 32                        # rnn_size (kept small for the example)
N_OUTPUT = 1 + N_GAUSSIAN * 6        # 121
N_OUT_PAD = ((N_OUTPUT + 127) // 128) * 128   # 128: lane-dense output slab
SEQ_LEN = 8
BATCH = 4
INPUT_SIZE = 3
NUM_LAYERS = 2

# Fused recurrent weight column layout (H = RNN_SIZE):
#   [0, 3H)              layer-0 hidden->hidden, gates r|z|n
#   [3H, L1_OFF)         zero pad so the layer-1 block starts on a 128-lane tile
#   [L1_OFF, +2H)        layer-1 r|z   (input + hidden parts K-concatenated)
#   [L1_OFF+2H, +3H)     layer-1 input n-part  (i_n + b_in)
#   [L1_OFF+3H, +4H)     layer-1 hidden n-part (h_n + b_hn)
L1_OFF = ((3 * RNN_SIZE + 127) // 128) * 128   # 128
W_COMB_N = L1_OFF + 4 * RNN_SIZE               # 256


def _gru_kernel(x_ref, wih0_ref, bi0_ref, wcomb_ref, bcomb_ref,
                wlin_ref, blin_ref, out_ref, hid_ref,
                *, seq_len, batch, hidden):
    """Whole-sequence 2-layer GRU + Linear + rho tanh in one invocation.

    x_ref     : (T*B, 3)         seq-major flattened input
    wih0_ref  : (3, 3H)          layer-0 input weights, columns r|z|n
    bi0_ref   : (1, 3H)          [b_ir+b_hr, b_iz+b_hz, b_in]
    wcomb_ref : (2H, 256)        fused recurrent weight (layout above);
                                 operand is [h0_{t-1} | h1_{t-2}]
    bcomb_ref : (1, 256)         [0, 0, b_hn0, pad, b_ir1+b_hr1, b_iz1+b_hz1, b_in1, b_hn1]
    wlin_ref  : (H, 128)         Linear weight, zero-padded to 128 lanes
    blin_ref  : (1, 128)         Linear bias, zero-padded
    out_ref   : (T*B, 128)       lane-dense output slab
    hid_ref   : (2, B, H)        final hidden state
    """
    f32 = jnp.float32
    T, B, H = seq_len, batch, hidden
    prec = lax.Precision.DEFAULT     # single-pass bf16 MXU lowering

    # ---- hoisted non-recurrent prologue: ALL timesteps' layer-0 input
    # projections as ONE (T*B,3)@(3,3H) matmul (r/z biases pre-folded).
    gi0_all = (jnp.dot(x_ref[...], wih0_ref[...],
                       preferred_element_type=f32, precision=prec)
               + bi0_ref[...])                                   # (T*B, 3H)

    wcomb = wcomb_ref[...]                                       # (2H, 256)
    bcomb = bcomb_ref[...]                                       # (1, 256)
    wlin = wlin_ref[...]                                         # (H, 128)
    blin = blin_ref[...]                                         # (1, 128)

    # rho = tanh(rho) column mask, hoisted (identical every step).
    col = lax.broadcasted_iota(jnp.int32, (B, N_OUT_PAD), 1)
    rho_mask = (col >= 4 * N_GAUSSIAN) & (col < 5 * N_GAUSSIAN)

    # hidden=None in PyTorch -> zeros
    h0c = jnp.zeros((B, H), f32)     # h0[i-1]
    h1c = jnp.zeros((B, H), f32)     # h1[i-2]

    # Wavefront (layer-skewed), fully-unrolled loop: iteration i computes
    # layer0(step i) and layer1(step i-1) off ONE fused matmul.
    for i in range(T + 1):
        hcat = jnp.concatenate([h0c, h1c], axis=1)               # (B, 2H)
        g = (jnp.dot(hcat, wcomb, preferred_element_type=f32, precision=prec)
             + bcomb)                                            # (B, 256)

        h0_new = h0c
        if i < T:                                                # ---- layer 0, step i
            gi0 = gi0_all[i * B:(i + 1) * B]
            rz0 = jax.nn.sigmoid(gi0[:, :2 * H] + g[:, :2 * H])
            r0, z0 = rz0[:, :H], rz0[:, H:2 * H]
            n0 = jnp.tanh(gi0[:, 2 * H:3 * H] + r0 * g[:, 2 * H:3 * H])
            h0_new = (1.0 - z0) * n0 + z0 * h0c

        if i >= 1:                                               # ---- layer 1, step i-1
            rz1 = jax.nn.sigmoid(g[:, L1_OFF:L1_OFF + 2 * H])
            r1, z1 = rz1[:, :H], rz1[:, H:2 * H]
            n1 = jnp.tanh(g[:, L1_OFF + 2 * H:L1_OFF + 3 * H]
                          + r1 * g[:, L1_OFF + 3 * H:L1_OFF + 4 * H])
            h1c = (1.0 - z1) * n1 + z1 * h1c

            # Output head for step i-1: off the recurrent critical path, so the
            # dot + store overlap with the next wavefront iteration.
            y = (jnp.dot(h1c, wlin, preferred_element_type=f32, precision=prec)
                 + blin)
            out_ref[(i - 1) * B:i * B, :] = jnp.where(rho_mask, jnp.tanh(y), y)

        h0c = h0_new

    # final hidden state, written once
    hid_ref[0] = h0c
    hid_ref[1] = h1c


# ---------------- parameter packing (one-time, outside the jitted hot path) --------
def pack_params(p):
    """PyTorch-layout GRU/Linear weights -> fused, bias-folded kernel layout."""
    H = RNN_SIZE

    def bgates(b):          # (3H,) -> (b_r, b_z, b_n)
        return b[:H], b[H:2 * H], b[2 * H:]

    # layer-0 input projection, gate order r|z|n along lanes; r/z biases pre-summed
    wih0_p = p["w_ih0"].T.astype(jnp.float32)                    # (3, 3H)
    bi_r, bi_z, bi_n = bgates(p["b_ih0"])
    bh_r, bh_z, bh_n0 = bgates(p["b_hh0"])
    bi0_p = jnp.concatenate([bi_r + bh_r, bi_z + bh_z, bi_n])[None, :]

    # fused recurrent weight; operand rows of the dot are [h0_{t-1} | h1_{t-2}]
    whh0_t = p["w_hh0"].T                                        # (H, 3H)  r|z|n
    wih1_t = p["w_ih1"].T                                        # (H, 3H)
    whh1_t = p["w_hh1"].T                                        # (H, 3H)
    wcomb = jnp.zeros((2 * H, W_COMB_N), jnp.float32)
    wcomb = wcomb.at[:H, 0:3 * H].set(whh0_t)                                 # L0 r|z|n
    wcomb = wcomb.at[:H, L1_OFF:L1_OFF + 2 * H].set(wih1_t[:, :2 * H])        # L1 i_r|i_z
    wcomb = wcomb.at[:H, L1_OFF + 2 * H:L1_OFF + 3 * H].set(wih1_t[:, 2 * H:])  # L1 i_n
    wcomb = wcomb.at[H:, L1_OFF:L1_OFF + 2 * H].set(whh1_t[:, :2 * H])        # L1 h_r|h_z
    wcomb = wcomb.at[H:, L1_OFF + 3 * H:L1_OFF + 4 * H].set(whh1_t[:, 2 * H:])  # L1 h_n

    b1i_r, b1i_z, b1i_n = bgates(p["b_ih1"])
    b1h_r, b1h_z, b1h_n = bgates(p["b_hh1"])
    bcomb = jnp.zeros((1, W_COMB_N), jnp.float32)
    bcomb = bcomb.at[0, 2 * H:3 * H].set(bh_n0)                  # L0 b_hn (inside r*(...))
    bcomb = bcomb.at[0, L1_OFF:L1_OFF + H].set(b1i_r + b1h_r)
    bcomb = bcomb.at[0, L1_OFF + H:L1_OFF + 2 * H].set(b1i_z + b1h_z)
    bcomb = bcomb.at[0, L1_OFF + 2 * H:L1_OFF + 3 * H].set(b1i_n)
    bcomb = bcomb.at[0, L1_OFF + 3 * H:L1_OFF + 4 * H].set(b1h_n)

    # Linear, transposed and zero-padded to a 128-wide lane-dense slab.
    wlin = jnp.zeros((H, N_OUT_PAD), jnp.float32).at[:, :N_OUTPUT].set(p["w_lin"].T)
    blin = jnp.zeros((1, N_OUT_PAD), jnp.float32).at[:, :N_OUTPUT].set(p["b_lin"])
    return wih0_p, bi0_p, wcomb, bcomb, wlin, blin


@jax.jit
def gaussian_writing_gru_forward(x, packed):
    """Returns (mu1, mu2, log_sigma1, log_sigma2, rho, pi_logits, z0_logits, hidden)."""
    T, B, _ = x.shape
    wih0_p, bi0_p, wcomb, bcomb, wlin, blin = packed
    x2d = x.reshape(T * B, INPUT_SIZE)        # wrapper-side reshape: layout plumbing

    kernel = functools.partial(_gru_kernel, seq_len=T, batch=B, hidden=RNN_SIZE)
    out_pad, hidden = pl.pallas_call(
        kernel,
        out_shape=(
            jax.ShapeDtypeStruct((T * B, N_OUT_PAD), jnp.float32),
            jax.ShapeDtypeStruct((NUM_LAYERS, B, RNN_SIZE), jnp.float32),
        ),
    )(x2d, wih0_p, bi0_p, wcomb, bcomb, wlin, blin)

    G = N_GAUSSIAN
    flat = out_pad[:, :N_OUTPUT]              # drop the 7 pad lanes
    mu1 = flat[:, 0 * G:1 * G]
    mu2 = flat[:, 1 * G:2 * G]
    log_sigma1 = flat[:, 2 * G:3 * G]
    log_sigma2 = flat[:, 3 * G:4 * G]
    rho = flat[:, 4 * G:5 * G]                # tanh already applied in-kernel
    pi_logits = flat[:, 5 * G:6 * G]
    z0_logits = flat[:, 6 * G:6 * G + 1]
    return mu1, mu2, log_sigma1, log_sigma2, rho, pi_logits, z0_logits, hidden


# ---------------- parameter init (deterministic, PyTorch-style uniform) -------------
def init_params(key):
    H = RNN_SIZE
    bound = 1.0 / (H ** 0.5)
    ks = jax.random.split(key, 10)

    def u(k, shape):
        return jax.random.uniform(k, shape, jnp.float32, -bound, bound)

    # PyTorch GRU: weight_ih_l* (3H, in), weight_hh_l* (3H, H), biases (3H,)
    return dict(
        w_ih0=u(ks[0], (3 * H, INPUT_SIZE)), w_hh0=u(ks[1], (3 * H, H)),
        b_ih0=u(ks[2], (3 * H,)), b_hh0=u(ks[3], (3 * H,)),
        w_ih1=u(ks[4], (3 * H, H)), w_hh1=u(ks[5], (3 * H, H)),
        b_ih1=u(ks[6], (3 * H,)), b_hh1=u(ks[7], (3 * H,)),
        w_lin=u(ks[8], (N_OUTPUT, H)), b_lin=u(ks[9], (N_OUTPUT,)),
    )


# ---------------- pure-JAX reference for correctness check -------------
def ref_forward(x, p):
    H = RNN_SIZE

    def cell(xt, h, w_ih, w_hh, b_ih, b_hh):
        gi = xt @ w_ih.T + b_ih
        gh = h @ w_hh.T + b_hh
        i_r, i_z, i_n = gi[:, :H], gi[:, H:2 * H], gi[:, 2 * H:]
        h_r, h_z, h_n = gh[:, :H], gh[:, H:2 * H], gh[:, 2 * H:]
        r = jax.nn.sigmoid(i_r + h_r)
        z = jax.nn.sigmoid(i_z + h_z)
        n = jnp.tanh(i_n + r * h_n)
        return (1.0 - z) * n + z * h

    def step(carry, xt):
        h0, h1 = carry
        h0 = cell(xt, h0, p["w_ih0"], p["w_hh0"], p["b_ih0"], p["b_hh0"])
        h1 = cell(h0, h1, p["w_ih1"], p["w_hh1"], p["b_ih1"], p["b_hh1"])
        return (h0, h1), h1

    z = jnp.zeros((x.shape[1], H), jnp.float32)
    (h0, h1), outs = lax.scan(step, (z, z), x)
    flat = outs.reshape(-1, H) @ p["w_lin"].T + p["b_lin"]
    G = N_GAUSSIAN
    return (flat[:, :G], flat[:, G:2 * G], flat[:, 2 * G:3 * G],
            flat[:, 3 * G:4 * G], jnp.tanh(flat[:, 4 * G:5 * G]),
            flat[:, 5 * G:6 * G], flat[:, 6 * G:6 * G + 1],
            jnp.stack([h0, h1]))


if __name__ == "__main__":
    key = jax.random.PRNGKey(0)
    pkey, xkey = jax.random.split(key)
    params = init_params(pkey)
    packed = pack_params(params)              # pre-packed once, off the hot path
    x = jax.random.normal(xkey, (SEQ_LEN, BATCH, INPUT_SIZE), jnp.float32)

    outs = gaussian_writing_gru_forward(x, packed)
    outs = jax.block_until_ready(outs)

    refs = ref_forward(x, params)
    names = ("mu1", "mu2", "log_sigma1", "log_sigma2", "rho",
             "pi_logits", "z0_logits", "hidden")
    # Both kernel and reference run the MXU at DEFAULT (bf16) precision, so the
    # residual difference is only f32 accumulation-order noise.
    for name, a, b in zip(names, outs, refs):
        assert a.shape == b.shape, (name, a.shape, b.shape)
        err = float(jnp.max(jnp.abs(a - b)))
        assert jnp.allclose(a, b, atol=5e-4, rtol=5e-4), (name, err)

    print("KERNEL_OK")
</pallas_src>

<mosaic_0001>
module attributes {stable_mosaic.version = 11 : i64} {
  func.func @_gru_kernel(%arg0: memref<32x3xf32, #tpu.memory_space<vmem>>, %arg1: memref<3x96xf32, #tpu.memory_space<vmem>>, %arg2: memref<1x96xf32, #tpu.memory_space<vmem>>, %arg3: memref<64x256xf32, #tpu.memory_space<vmem>>, %arg4: memref<1x256xf32, #tpu.memory_space<vmem>>, %arg5: memref<32x128xf32, #tpu.memory_space<vmem>>, %arg6: memref<1x128xf32, #tpu.memory_space<vmem>>, %arg7: memref<32x128xf32, #tpu.memory_space<vmem>>, %arg8: memref<2x4x32xf32, #tpu.memory_space<vmem>>) attributes {dimension_semantics = [], scalar_prefetch = 0 : i64, scratch_operands = 0 : i64, tpu.core_type = #tpu.core_type<tc>} {
    %c0 = arith.constant 0 : index
    %c0_0 = arith.constant 0 : index
    %0 = vector.load %arg0[%c0, %c0_0] : memref<32x3xf32, #tpu.memory_space<vmem>>, vector<32x3xf32>
    %c0_1 = arith.constant 0 : index
    %c0_2 = arith.constant 0 : index
    %1 = vector.load %arg1[%c0_1, %c0_2] : memref<3x96xf32, #tpu.memory_space<vmem>>, vector<3x96xf32>
    %cst = arith.constant dense<0.000000e+00> : vector<32x96xf32>
    %2 = tpu.matmul %0, %1, %cst {dimension_numbers = #tpu.dot_dimension_numbers<[1], [0], [0], [1], [0, 0, 1, 1], [], []>} : vector<32x3xf32>, vector<3x96xf32>, vector<32x96xf32> -> vector<32x96xf32>
    %c0_3 = arith.constant 0 : index
    %c0_4 = arith.constant 0 : index
    %3 = vector.load %arg2[%c0_3, %c0_4] : memref<1x96xf32, #tpu.memory_space<vmem>>, vector<1x96xf32>
    %4 = vector.broadcast %3 : vector<1x96xf32> to vector<32x96xf32>
    %5 = arith.addf %2, %4 : vector<32x96xf32>
    %c0_5 = arith.constant 0 : index
    %c0_6 = arith.constant 0 : index
    %6 = vector.load %arg3[%c0_5, %c0_6] : memref<64x256xf32, #tpu.memory_space<vmem>>, vector<64x256xf32>
    %c0_7 = arith.constant 0 : index
    %c0_8 = arith.constant 0 : index
    %7 = vector.load %arg4[%c0_7, %c0_8] : memref<1x256xf32, #tpu.memory_space<vmem>>, vector<1x256xf32>
    %c0_9 = arith.constant 0 : index
    %c0_10 = arith.constant 0 : index
    %8 = vector.load %arg5[%c0_9, %c0_10] : memref<32x128xf32, #tpu.memory_space<vmem>>, vector<32x128xf32>
    %c0_11 = arith.constant 0 : index
    %c0_12 = arith.constant 0 : index
    %9 = vector.load %arg6[%c0_11, %c0_12] : memref<1x128xf32, #tpu.memory_space<vmem>>, vector<1x128xf32>
    %10 = tpu.iota {dimensions = array<i32: 1>} : vector<4x128xi32>
    %c80_i32 = arith.constant 80 : i32
    %11 = vector.broadcast %c80_i32 : i32 to vector<4x128xi32>
    %12 = arith.cmpi sge, %10, %11 : vector<4x128xi32>
    %c100_i32 = arith.constant 100 : i32
    %13 = vector.broadcast %c100_i32 : i32 to vector<4x128xi32>
    %14 = arith.cmpi slt, %10, %13 : vector<4x128xi32>
    %15 = arith.andi %12, %14 : vector<4x128xi1>
    %cst_13 = arith.constant 0.000000e+00 : f32
    %16 = vector.broadcast %cst_13 : f32 to vector<4x32xf32>
    %cst_14 = arith.constant 0.000000e+00 : f32
    %17 = vector.broadcast %cst_14 : f32 to vector<4x32xf32>
    %18 = tpu.concatenate %16, %17 in 1 : vector<4x32xf32>, vector<4x32xf32> -> vector<4x64xf32>
    %cst_15 = arith.constant dense<0.000000e+00> : vector<4x256xf32>
    %19 = tpu.matmul %18, %6, %cst_15 {dimension_numbers = #tpu.dot_dimension_numbers<[1], [0], [0], [1], [0, 0, 1, 1], [], []>} : vector<4x64xf32>, vector<64x256xf32>, vector<4x256xf32> -> vector<4x256xf32>
    %20 = vector.broadcast %7 : vector<1x256xf32> to vector<4x256xf32>
    %21 = arith.addf %19, %20 : vector<4x256xf32>
    %22 = vector.extract_strided_slice %5 {offsets = [0, 0], sizes = [4, 96], strides = [1, 1]} : vector<32x96xf32> to vector<4x96xf32>
    %23 = vector.extract_strided_slice %22 {offsets = [0, 0], sizes = [4, 64], strides = [1, 1]} : vector<4x96xf32> to vector<4x64xf32>
    %24 = vector.extract_strided_slice %21 {offsets = [0, 0], sizes = [4, 64], strides = [1, 1]} : vector<4x256xf32> to vector<4x64xf32>
    %25 = arith.addf %23, %24 : vector<4x64xf32>
    %26 = arith.negf %25 : vector<4x64xf32>
    %27 = math.exp %26 : vector<4x64xf32>
    %cst_16 = arith.constant 1.000000e+00 : f32
    %28 = vector.broadcast %cst_16 : f32 to vector<4x64xf32>
    %29 = arith.addf %28, %27 : vector<4x64xf32>
    %30 = arith.divf %28, %29 : vector<4x64xf32>
    %31 = vector.extract_strided_slice %30 {offsets = [0, 0], sizes = [4, 32], strides = [1, 1]} : vector<4x64xf32> to vector<4x32xf32>
    %32 = vector.extract_strided_slice %30 {offsets = [0, 32], sizes = [4, 32], strides = [1, 1]} : vector<4x64xf32> to vector<4x32xf32>
    %33 = vector.extract_strided_slice %22 {offsets = [0, 64], sizes = [4, 32], strides = [1, 1]} : vector<4x96xf32> to vector<4x32xf32>
    %34 = vector.extract_strided_slice %21 {offsets = [0, 64], sizes = [4, 32], strides = [1, 1]} : vector<4x256xf32> to vector<4x32xf32>
    %35 = arith.mulf %31, %34 : vector<4x32xf32>
    %36 = arith.addf %33, %35 : vector<4x32xf32>
    %37 = math.tanh %36 : vector<4x32xf32>
    %cst_17 = arith.constant 1.000000e+00 : f32
    %38 = vector.broadcast %cst_17 : f32 to vector<4x32xf32>
    %39 = arith.subf %38, %32 : vector<4x32xf32>
    %40 = arith.mulf %39, %37 : vector<4x32xf32>
    %41 = arith.mulf %32, %16 : vector<4x32xf32>
    %42 = arith.addf %40, %41 : vector<4x32xf32>
    %43 = tpu.concatenate %42, %17 in 1 : vector<4x32xf32>, vector<4x32xf32> -> vector<4x64xf32>
    %cst_18 = arith.constant dense<0.000000e+00> : vector<4x256xf32>
    %44 = tpu.matmul %43, %6, %cst_18 {dimension_numbers = #tpu.dot_dimension_numbers<[1], [0], [0], [1], [0, 0, 1, 1], [], []>} : vector<4x64xf32>, vector<64x256xf32>, vector<4x256xf32> -> vector<4x256xf32>
    %45 = vector.broadcast %7 : vector<1x256xf32> to vector<4x256xf32>
    %46 = arith.addf %44, %45 : vector<4x256xf32>
    %47 = vector.extract_strided_slice %5 {offsets = [4, 0], sizes = [4, 96], strides = [1, 1]} : vector<32x96xf32> to vector<4x96xf32>
    %48 = vector.extract_strided_slice %47 {offsets = [0, 0], sizes = [4, 64], strides = [1, 1]} : vector<4x96xf32> to vector<4x64xf32>
    %49 = vector.extract_strided_slice %46 {offsets = [0, 0], sizes = [4, 64], strides = [1, 1]} : vector<4x256xf32> to vector<4x64xf32>
    %50 = arith.addf %48, %49 : vector<4x64xf32>
    %51 = arith.negf %50 : vector<4x64xf32>
    %52 = math.exp %51 : vector<4x64xf32>
    %cst_19 = arith.constant 1.000000e+00 : f32
    %53 = vector.broadcast %cst_19 : f32 to vector<4x64xf32>
    %54 = arith.addf %53, %52 : vector<4x64xf32>
    %55 = arith.divf %53, %54 : vector<4x64xf32>
    %56 = vector.extract_strided_slice %55 {offsets = [0, 0], sizes = [4, 32], strides = [1, 1]} : vector<4x64xf32> to vector<4x32xf32>
    %57 = vector.extract_strided_slice %55 {offsets = [0, 32], sizes = [4, 32], strides = [1, 1]} : vector<4x64xf32> to vector<4x32xf32>
    %58 = vector.extract_strided_slice %47 {offsets = [0, 64], sizes = [4, 32], strides = [1, 1]} : vector<4x96xf32> to vector<4x32xf32>
    %59 = vector.extract_strided_slice %46 {offsets = [0, 64], sizes = [4, 32], strides = [1, 1]} : vector<4x256xf32> to vector<4x32xf32>
    %60 = arith.mulf %56, %59 : vector<4x32xf32>
    %61 = arith.addf %58, %60 : vector<4x32xf32>
    %62 = math.tanh %61 : vector<4x32xf32>
    %cst_20 = arith.constant 1.000000e+00 : f32
    %63 = vector.broadcast %cst_20 : f32 to vector<4x32xf32>
    %64 = arith.subf %63, %57 : vector<4x32xf32>
    %65 = arith.mulf %64, %62 : vector<4x32xf32>
    %66 = arith.mulf %57, %42 : vector<4x32xf32>
    %67 = arith.addf %65, %66 : vector<4x32xf32>
    %68 = vector.extract_strided_slice %46 {offsets = [0, 128], sizes = [4, 64], strides = [1, 1]} : vector<4x256xf32> to vector<4x64xf32>
    %69 = arith.negf %68 : vector<4x64xf32>
    %70 = math.exp %69 : vector<4x64xf32>
    %cst_21 = arith.constant 1.000000e+00 : f32
    %71 = vector.broadcast %cst_21 : f32 to vector<4x64xf32>
    %72 = arith.addf %71, %70 : vector<4x64xf32>
    %73 = arith.divf %71, %72 : vector<4x64xf32>
    %74 = vector.extract_strided_slice %73 {offsets = [0, 0], sizes = [4, 32], strides = [1, 1]} : vector<4x64xf32> to vector<4x32xf32>
    %75 = vector.extract_strided_slice %73 {offsets = [0, 32], sizes = [4, 32], strides = [1, 1]} : vector<4x64xf32> to vector<4x32xf32>
    %76 = vector.extract_strided_slice %46 {offsets = [0, 192], sizes = [4, 32], strides = [1, 1]} : vector<4x256xf32> to vector<4x32xf32>
    %77 = vector.extract_strided_slice %46 {offsets = [0, 224], sizes = [4, 32], strides = [1, 1]} : vector<4x256xf32> to vector<4x32xf32>
    %78 = arith.mulf %74, %77 : vector<4x32xf32>
    %79 = arith.addf %76, %78 : vector<4x32xf32>
    %80 = math.tanh %79 : vector<4x32xf32>
    %cst_22 = arith.constant 1.000000e+00 : f32
    %81 = vector.broadcast %cst_22 : f32 to vector<4x32xf32>
    %82 = arith.subf %81, %75 : vector<4x32xf32>
    %83 = arith.mulf %82, %80 : vector<4x32xf32>
    %84 = arith.mulf %75, %17 : vector<4x32xf32>
    %85 = arith.addf %83, %84 : vector<4x32xf32>
    %cst_23 = arith.constant dense<0.000000e+00> : vector<4x128xf32>
    %86 = tpu.matmul %85, %8, %cst_23 {dimension_numbers = #tpu.dot_dimension_numbers<[1], [0], [0], [1], [0, 0, 1, 1], [], []>} : vector<4x32xf32>, vector<32x128xf32>, vector<4x128xf32> -> vector<4x128xf32>
    %87 = vector.broadcast %9 : vector<1x128xf32> to vector<4x128xf32>
    %88 = arith.addf %86, %87 : vector<4x128xf32>
    %89 = math.tanh %88 : vector<4x128xf32>
    %90 = arith.select %15, %89, %88 : vector<4x128xi1>, vector<4x128xf32>
    %c0_24 = arith.constant 0 : index
    %c0_25 = arith.constant 0 : index
    %91 = vector.load %arg7[%c0_24, %c0_25] : memref<32x128xf32, #tpu.memory_space<vmem>>, vector<4x128xf32>
    tpu.vector_store %arg7[%c0_24, %c0_25], %90 {strides = array<i32>} : memref<32x128xf32, #tpu.memory_space<vmem>>, vector<4x128xf32>,
    %92 = tpu.concatenate %67, %85 in 1 : vector<4x32xf32>, vector<4x32xf32> -> vector<4x64xf32>
    %cst_26 = arith.constant dense<0.000000e+00> : vector<4x256xf32>
    %93 = tpu.matmul %92, %6, %cst_26 {dimension_numbers = #tpu.dot_dimension_numbers<[1], [0], [0], [1], [0, 0, 1, 1], [], []>} : vector<4x64xf32>, vector<64x256xf32>, vector<4x256xf32> -> vector<4x256xf32>
    %94 = vector.broadcast %7 : vector<1x256xf32> to vector<4x256xf32>
    %95 = arith.addf %93, %94 : vector<4x256xf32>
    %96 = vector.extract_strided_slice %5 {offsets = [8, 0], sizes = [4, 96], strides = [1, 1]} : vector<32x96xf32> to vector<4x96xf32>
    %97 = vector.extract_strided_slice %96 {offsets = [0, 0], sizes = [4, 64], strides = [1, 1]} : vector<4x96xf32> to vector<4x64xf32>
    %98 = vector.extract_strided_slice %95 {offsets = [0, 0], sizes = [4, 64], strides = [1, 1]} : vector<4x256xf32> to vector<4x64xf32>
    %99 = arith.addf %97, %98 : vector<4x64xf32>
    %100 = arith.negf %99 : vector<4x64xf32>
    %101 = math.exp %100 : vector<4x64xf32>
    %cst_27 = arith.constant 1.000000e+00 : f32
    %102 = vector.broadcast %cst_27 : f32 to vector<4x64xf32>
    %103 = arith.addf %102, %101 : vector<4x64xf32>
    %104 = arith.divf %102, %103 : vector<4x64xf32>
    %105 = vector.extract_strided_slice %104 {offsets = [0, 0], sizes = [4, 32], strides = [1, 1]} : vector<4x64xf32> to vector<4x32xf32>
    %106 = vector.extract_strided_slice %104 {offsets = [0, 32], sizes = [4, 32], strides = [1, 1]} : vector<4x64xf32> to vector<4x32xf32>
    %107 = vector.extract_strided_slice %96 {offsets = [0, 64], sizes = [4, 32], strides = [1, 1]} : vector<4x96xf32> to vector<4x32xf32>
    %108 = vector.extract_strided_slice %95 {offsets = [0, 64], sizes = [4, 32], strides = [1, 1]} : vector<4x256xf32> to vector<4x32xf32>
    %109 = arith.mulf %105, %108 : vector<4x32xf32>
    %110 = arith.addf %107, %109 : vector<4x32xf32>
    %111 = math.tanh %110 : vector<4x32xf32>
    %cst_28 = arith.constant 1.000000e+00 : f32
    %112 = vector.broadcast %cst_28 : f32 to vector<4x32xf32>
    %113 = arith.subf %112, %106 : vector<4x32xf32>
    %114 = arith.mulf %113, %111 : vector<4x32xf32>
    %115 = arith.mulf %106, %67 : vector<4x32xf32>
    %116 = arith.addf %114, %115 : vector<4x32xf32>
    %117 = vector.extract_strided_slice %95 {offsets = [0, 128], sizes = [4, 64], strides = [1, 1]} : vector<4x256xf32> to vector<4x64xf32>
    %118 = arith.negf %117 : vector<4x64xf32>
    %119 = math.exp %118 : vector<4x64xf32>
    %cst_29 = arith.constant 1.000000e+00 : f32
    %120 = vector.broadcast %cst_29 : f32 to vector<4x64xf32>
    %121 = arith.addf %120, %119 : vector<4x64xf32>
    %122 = arith.divf %120, %121 : vector<4x64xf32>
    %123 = vector.extract_strided_slice %122 {offsets = [0, 0], sizes = [4, 32], strides = [1, 1]} : vector<4x64xf32> to vector<4x32xf32>
    %124 = vector.extract_strided_slice %122 {offsets = [0, 32], sizes = [4, 32], strides = [1, 1]} : vector<4x64xf32> to vector<4x32xf32>
    %125 = vector.extract_strided_slice %95 {offsets = [0, 192], sizes = [4, 32], strides = [1, 1]} : vector<4x256xf32> to vector<4x32xf32>
    %126 = vector.extract_strided_slice %95 {offsets = [0, 224], sizes = [4, 32], strides = [1, 1]} : vector<4x256xf32> to vector<4x32xf32>
    %127 = arith.mulf %123, %126 : vector<4x32xf32>
    %128 = arith.addf %125, %127 : vector<4x32xf32>
    %129 = math.tanh %128 : vector<4x32xf32>
    %cst_30 = arith.constant 1.000000e+00 : f32
    %130 = vector.broadcast %cst_30 : f32 to vector<4x32xf32>
    %131 = arith.subf %130, %124 : vector<4x32xf32>
    %132 = arith.mulf %131, %129 : vector<4x32xf32>
    %133 = arith.mulf %124, %85 : vector<4x32xf32>
    %134 = arith.addf %132, %133 : vector<4x32xf32>
    %cst_31 = arith.constant dense<0.000000e+00> : vector<4x128xf32>
    %135 = tpu.matmul %134, %8, %cst_31 {dimension_numbers = #tpu.dot_dimension_numbers<[1], [0], [0], [1], [0, 0, 1, 1], [], []>} : vector<4x32xf32>, vector<32x128xf32>, vector<4x128xf32> -> vector<4x128xf32>
    %136 = vector.broadcast %9 : vector<1x128xf32> to vector<4x128xf32>
    %137 = arith.addf %135, %136 : vector<4x128xf32>
    %138 = math.tanh %137 : vector<4x128xf32>
    %139 = arith.select %15, %138, %137 : vector<4x128xi1>, vector<4x128xf32>
    %c4 = arith.constant 4 : index
    %c0_32 = arith.constant 0 : index
    %140 = vector.load %arg7[%c4, %c0_32] : memref<32x128xf32, #tpu.memory_space<vmem>>, vector<4x128xf32>
    tpu.vector_store %arg7[%c4, %c0_32], %139 {strides = array<i32>} : memref<32x128xf32, #tpu.memory_space<vmem>>, vector<4x128xf32>,
    %141 = tpu.concatenate %116, %134 in 1 : vector<4x32xf32>, vector<4x32xf32> -> vector<4x64xf32>
    %cst_33 = arith.constant dense<0.000000e+00> : vector<4x256xf32>
    %142 = tpu.matmul %141, %6, %cst_33 {dimension_numbers = #tpu.dot_dimension_numbers<[1], [0], [0], [1], [0, 0, 1, 1], [], []>} : vector<4x64xf32>, vector<64x256xf32>, vector<4x256xf32> -> vector<4x256xf32>
    %143 = vector.broadcast %7 : vector<1x256xf32> to vector<4x256xf32>
    %144 = arith.addf %142, %143 : vector<4x256xf32>
    %145 = vector.extract_strided_slice %5 {offsets = [12, 0], sizes = [4, 96], strides = [1, 1]} : vector<32x96xf32> to vector<4x96xf32>
    %146 = vector.extract_strided_slice %145 {offsets = [0, 0], sizes = [4, 64], strides = [1, 1]} : vector<4x96xf32> to vector<4x64xf32>
    %147 = vector.extract_strided_slice %144 {offsets = [0, 0], sizes = [4, 64], strides = [1, 1]} : vector<4x256xf32> to vector<4x64xf32>
    %148 = arith.addf %146, %147 : vector<4x64xf32>
    %149 = arith.negf %148 : vector<4x64xf32>
    %150 = math.exp %149 : vector<4x64xf32>
    %cst_34 = arith.constant 1.000000e+00 : f32
    %151 = vector.broadcast %cst_34 : f32 to vector<4x64xf32>
    %152 = arith.addf %151, %150 : vector<4x64xf32>
    %153 = arith.divf %151, %152 : vector<4x64xf32>
    %154 = vector.extract_strided_slice %153 {offsets = [0, 0], sizes = [4, 32], strides = [1, 1]} : vector<4x64xf32> to vector<4x32xf32>
    %155 = vector.extract_strided_slice %153 {offsets = [0, 32], sizes = [4, 32], strides = [1, 1]} : vector<4x64xf32> to vector<4x32xf32>
    %156 = vector.extract_strided_slice %145 {offsets = [0, 64], sizes = [4, 32], strides = [1, 1]} : vector<4x96xf32> to vector<4x32xf32>
    %157 = vector.extract_strided_slice %144 {offsets = [0, 64], sizes = [4, 32], strides = [1, 1]} : vector<4x256xf32> to vector<4x32xf32>
    %158 = arith.mulf %154, %157 : vector<4x32xf32>
    %159 = arith.addf %156, %158 : vector<4x32xf32>
    %160 = math.tanh %159 : vector<4x32xf32>
    %cst_35 = arith.constant 1.000000e+00 : f32
    %161 = vector.broadcast %cst_35 : f32 to vector<4x32xf32>
    %162 = arith.subf %161, %155 : vector<4x32xf32>
    %163 = arith.mulf %162, %160 : vector<4x32xf32>
    %164 = arith.mulf %155, %116 : vector<4x32xf32>
    %165 = arith.addf %163, %164 : vector<4x32xf32>
    %166 = vector.extract_strided_slice %144 {offsets = [0, 128], sizes = [4, 64], strides = [1, 1]} : vector<4x256xf32> to vector<4x64xf32>
    %167 = arith.negf %166 : vector<4x64xf32>
    %168 = math.exp %167 : vector<4x64xf32>
    %cst_36 = arith.constant 1.000000e+00 : f32
    %169 = vector.broadcast %cst_36 : f32 to vector<4x64xf32>
    %170 = arith.addf %169, %168 : vector<4x64xf32>
    %171 = arith.divf %169, %170 : vector<4x64xf32>
    %172 = vector.extract_strided_slice %171 {offsets = [0, 0], sizes = [4, 32], strides = [1, 1]} : vector<4x64xf32> to vector<4x32xf32>
    %173 = vector.extract_strided_slice %171 {offsets = [0, 32], sizes = [4, 32], strides = [1, 1]} : vector<4x64xf32> to vector<4x32xf32>
    %174 = vector.extract_strided_slice %144 {offsets = [0, 192], sizes = [4, 32], strides = [1, 1]} : vector<4x256xf32> to vector<4x32xf32>
    %175 = vector.extract_strided_slice %144 {offsets = [0, 224], sizes = [4, 32], strides = [1, 1]} : vector<4x256xf32> to vector<4x32xf32>
    %176 = arith.mulf %172, %175 : vector<4x32xf32>
    %177 = arith.addf %174, %176 : vector<4x32xf32>
    %178 = math.tanh %177 : vector<4x32xf32>
    %cst_37 = arith.constant 1.000000e+00 : f32
    %179 = vector.broadcast %cst_37 : f32 to vector<4x32xf32>
    %180 = arith.subf %179, %173 : vector<4x32xf32>
    %181 = arith.mulf %180, %178 : vector<4x32xf32>
    %182 = arith.mulf %173, %134 : vector<4x32xf32>
    %183 = arith.addf %181, %182 : vector<4x32xf32>
    %cst_38 = arith.constant dense<0.000000e+00> : vector<4x128xf32>
    %184 = tpu.matmul %183, %8, %cst_38 {dimension_numbers = #tpu.dot_dimension_numbers<[1], [0], [0], [1], [0, 0, 1, 1], [], []>} : vector<4x32xf32>, vector<32x128xf32>, vector<4x128xf32> -> vector<4x128xf32>
    %185 = vector.broadcast %9 : vector<1x128xf32> to vector<4x128xf32>
    %186 = arith.addf %184, %185 : vector<4x128xf32>
    %187 = math.tanh %186 : vector<4x128xf32>
    %188 = arith.select %15, %187, %186 : vector<4x128xi1>, vector<4x128xf32>
    %c8 = arith.constant 8 : index
    %c0_39 = arith.constant 0 : index
    %189 = vector.load %arg7[%c8, %c0_39] : memref<32x128xf32, #tpu.memory_space<vmem>>, vector<4x128xf32>
    tpu.vector_store %arg7[%c8, %c0_39], %188 {strides = array<i32>} : memref<32x128xf32, #tpu.memory_space<vmem>>, vector<4x128xf32>,
    %190 = tpu.concatenate %165, %183 in 1 : vector<4x32xf32>, vector<4x32xf32> -> vector<4x64xf32>
    %cst_40 = arith.constant dense<0.000000e+00> : vector<4x256xf32>
    %191 = tpu.matmul %190, %6, %cst_40 {dimension_numbers = #tpu.dot_dimension_numbers<[1], [0], [0], [1], [0, 0, 1, 1], [], []>} : vector<4x64xf32>, vector<64x256xf32>, vector<4x256xf32> -> vector<4x256xf32>
    %192 = vector.broadcast %7 : vector<1x256xf32> to vector<4x256xf32>
    %193 = arith.addf %191, %192 : vector<4x256xf32>
    %194 = vector.extract_strided_slice %5 {offsets = [16, 0], sizes = [4, 96], strides = [1, 1]} : vector<32x96xf32> to vector<4x96xf32>
    %195 = vector.extract_strided_slice %194 {offsets = [0, 0], sizes = [4, 64], strides = [1, 1]} : vector<4x96xf32> to vector<4x64xf32>
    %196 = vector.extract_strided_slice %193 {offsets = [0, 0], sizes = [4, 64], strides = [1, 1]} : vector<4x256xf32> to vector<4x64xf32>
    %197 = arith.addf %195, %196 : vector<4x64xf32>
    %198 = arith.negf %197 : vector<4x64xf32>
    %199 = math.exp %198 : vector<4x64xf32>
    %cst_41 = arith.constant 1.000000e+00 : f32
    %200 = vector.broadcast %cst_41 : f32 to vector<4x64xf32>
    %201 = arith.addf %200, %199 : vector<4x64xf32>
    %202 = arith.divf %200, %201 : vector<4x64xf32>
    %203 = vector.extract_strided_slice %202 {offsets = [0, 0], sizes = [4, 32], strides = [1, 1]} : vector<4x64xf32> to vector<4x32xf32>
    %204 = vector.extract_strided_slice %202 {offsets = [0, 32], sizes = [4, 32], strides = [1, 1]} : vector<4x64xf32> to vector<4x32xf32>
    %205 = vector.extract_strided_slice %194 {offsets = [0, 64], sizes = [4, 32], strides = [1, 1]} : vector<4x96xf32> to vector<4x32xf32>
    %206 = vector.extract_strided_slice %193 {offsets = [0, 64], sizes = [4, 32], strides = [1, 1]} : vector<4x256xf32> to vector<4x32xf32>
    %207 = arith.mulf %203, %206 : vector<4x32xf32>
    %208 = arith.addf %205, %207 : vector<4x32xf32>
    %209 = math.tanh %208 : vector<4x32xf32>
    %cst_42 = arith.constant 1.000000e+00 : f32
    %210 = vector.broadcast %cst_42 : f32 to vector<4x32xf32>
    %211 = arith.subf %210, %204 : vector<4x32xf32>
    %212 = arith.mulf %211, %209 : vector<4x32xf32>
    %213 = arith.mulf %204, %165 : vector<4x32xf32>
    %214 = arith.addf %212, %213 : vector<4x32xf32>
    %215 = vector.extract_strided_slice %193 {offsets = [0, 128], sizes = [4, 64], strides = [1, 1]} : vector<4x256xf32> to vector<4x64xf32>
    %216 = arith.negf %215 : vector<4x64xf32>
    %217 = math.exp %216 : vector<4x64xf32>
    %cst_43 = arith.constant 1.000000e+00 : f32
    %218 = vector.broadcast %cst_43 : f32 to vector<4x64xf32>
    %219 = arith.addf %218, %217 : vector<4x64xf32>
    %220 = arith.divf %218, %219 : vector<4x64xf32>
    %221 = vector.extract_strided_slice %220 {offsets = [0, 0], sizes = [4, 32], strides = [1, 1]} : vector<4x64xf32> to vector<4x32xf32>
    %222 = vector.extract_strided_slice %220 {offsets = [0, 32], sizes = [4, 32], strides = [1, 1]} : vector<4x64xf32> to vector<4x32xf32>
    %223 = vector.extract_strided_slice %193 {offsets = [0, 192], sizes = [4, 32], strides = [1, 1]} : vector<4x256xf32> to vector<4x32xf32>
    %224 = vector.extract_strided_slice %193 {offsets = [0, 224], sizes = [4, 32], strides = [1, 1]} : vector<4x256xf32> to vector<4x32xf32>
    %225 = arith.mulf %221, %224 : vector<4x32xf32>
    %226 = arith.addf %223, %225 : vector<4x32xf32>
    %227 = math.tanh %226 : vector<4x32xf32>
    %cst_44 = arith.constant 1.000000e+00 : f32
    %228 = vector.broadcast %cst_44 : f32 to vector<4x32xf32>
    %229 = arith.subf %228, %222 : vector<4x32xf32>
    %230 = arith.mulf %229, %227 : vector<4x32xf32>
    %231 = arith.mulf %222, %183 : vector<4x32xf32>
    %232 = arith.addf %230, %231 : vector<4x32xf32>
    %cst_45 = arith.constant dense<0.000000e+00> : vector<4x128xf32>
    %233 = tpu.matmul %232, %8, %cst_45 {dimension_numbers = #tpu.dot_dimension_numbers<[1], [0], [0], [1], [0, 0, 1, 1], [], []>} : vector<4x32xf32>, vector<32x128xf32>, vector<4x128xf32> -> vector<4x128xf32>
    %234 = vector.broadcast %9 : vector<1x128xf32> to vector<4x128xf32>
    %235 = arith.addf %233, %234 : vector<4x128xf32>
    %236 = math.tanh %235 : vector<4x128xf32>
    %237 = arith.select %15, %236, %235 : vector<4x128xi1>, vector<4x128xf32>
    %c12 = arith.constant 12 : index
    %c0_46 = arith.constant 0 : index
    %238 = vector.load %arg7[%c12, %c0_46] : memref<32x128xf32, #tpu.memory_space<vmem>>, vector<4x128xf32>
    tpu.vector_store %arg7[%c12, %c0_46], %237 {strides = array<i32>} : memref<32x128xf32, #tpu.memory_space<vmem>>, vector<4x128xf32>,
    %239 = tpu.concatenate %214, %232 in 1 : vector<4x32xf32>, vector<4x32xf32> -> vector<4x64xf32>
    %cst_47 = arith.constant dense<0.000000e+00> : vector<4x256xf32>
    %240 = tpu.matmul %239, %6, %cst_47 {dimension_numbers = #tpu.dot_dimension_numbers<[1], [0], [0], [1], [0, 0, 1, 1], [], []>} : vector<4x64xf32>, vector<64x256xf32>, vector<4x256xf32> -> vector<4x256xf32>
    %241 = vector.broadcast %7 : vector<1x256xf32> to vector<4x256xf32>
    %242 = arith.addf %240, %241 : vector<4x256xf32>
    %243 = vector.extract_strided_slice %5 {offsets = [20, 0], sizes = [4, 96], strides = [1, 1]} : vector<32x96xf32> to vector<4x96xf32>
    %244 = vector.extract_strided_slice %243 {offsets = [0, 0], sizes = [4, 64], strides = [1, 1]} : vector<4x96xf32> to vector<4x64xf32>
    %245 = vector.extract_strided_slice %242 {offsets = [0, 0], sizes = [4, 64], strides = [1, 1]} : vector<4x256xf32> to vector<4x64xf32>
    %246 = arith.addf %244, %245 : vector<4x64xf32>
    %247 = arith.negf %246 : vector<4x64xf32>
    %248 = math.exp %247 : vector<4x64xf32>
    %cst_48 = arith.constant 1.000000e+00 : f32
    %249 = vector.broadcast %cst_48 : f32 to vector<4x64xf32>
    %250 = arith.addf %249, %248 : vector<4x64xf32>
    %251 = arith.divf %249, %250 : vector<4x64xf32>
    %252 = vector.extract_strided_slice %251 {offsets = [0, 0], sizes = [4, 32], strides = [1, 1]} : vector<4x64xf32> to vector<4x32xf32>
    %253 = vector.extract_strided_slice %251 {offsets = [0, 32], sizes = [4, 32], strides = [1, 1]} : vector<4x64xf32> to vector<4x32xf32>
    %254 = vector.extract_strided_slice %243 {offsets = [0, 64], sizes = [4, 32], strides = [1, 1]} : vector<4x96xf32> to vector<4x32xf32>
    %255 = vector.extract_strided_slice %242 {offsets = [0, 64], sizes = [4, 32], strides = [1, 1]} : vector<4x256xf32> to vector<4x32xf32>
    %256 = arith.mulf %252, %255 : vector<4x32xf32>
    %257 = arith.addf %254, %256 : vector<4x32xf32>
    %258 = math.tanh %257 : vector<4x32xf32>
    %cst_49 = arith.constant 1.000000e+00 : f32
    %259 = vector.broadcast %cst_49 : f32 to vector<4x32xf32>
    %260 = arith.subf %259, %253 : vector<4x32xf32>
    %261 = arith.mulf %260, %258 : vector<4x32xf32>
    %262 = arith.mulf %253, %214 : vector<4x32xf32>
    %263 = arith.addf %261, %262 : vector<4x32xf32>
    %264 = vector.extract_strided_slice %242 {offsets = [0, 128], sizes = [4, 64], strides = [1, 1]} : vector<4x256xf32> to vector<4x64xf32>
    %265 = arith.negf %264 : vector<4x64xf32>
    %266 = math.exp %265 : vector<4x64xf32>
    %cst_50 = arith.constant 1.000000e+00 : f32
    %267 = vector.broadcast %cst_50 : f32 to vector<4x64xf32>
    %268 = arith.addf %267, %266 : vector<4x64xf32>
    %269 = arith.divf %267, %268 : vector<4x64xf32>
    %270 = vector.extract_strided_slice %269 {offsets = [0, 0], sizes = [4, 32], strides = [1, 1]} : vector<4x64xf32> to vector<4x32xf32>
    %271 = vector.extract_strided_slice %269 {offsets = [0, 32], sizes = [4, 32], strides = [1, 1]} : vector<4x64xf32> to vector<4x32xf32>
    %272 = vector.extract_strided_slice %242 {offsets = [0, 192], sizes = [4, 32], strides = [1, 1]} : vector<4x256xf32> to vector<4x32xf32>
    %273 = vector.extract_strided_slice %242 {offsets = [0, 224], sizes = [4, 32], strides = [1, 1]} : vector<4x256xf32> to vector<4x32xf32>
    %274 = arith.mulf %270, %273 : vector<4x32xf32>
    %275 = arith.addf %272, %274 : vector<4x32xf32>
    %276 = math.tanh %275 : vector<4x32xf32>
    %cst_51 = arith.constant 1.000000e+00 : f32
    %277 = vector.broadcast %cst_51 : f32 to vector<4x32xf32>
    %278 = arith.subf %277, %271 : vector<4x32xf32>
    %279 = arith.mulf %278, %276 : vector<4x32xf32>
    %280 = arith.mulf %271, %232 : vector<4x32xf32>
    %281 = arith.addf %279, %280 : vector<4x32xf32>
    %cst_52 = arith.constant dense<0.000000e+00> : vector<4x128xf32>
    %282 = tpu.matmul %281, %8, %cst_52 {dimension_numbers = #tpu.dot_dimension_numbers<[1], [0], [0], [1], [0, 0, 1, 1], [], []>} : vector<4x32xf32>, vector<32x128xf32>, vector<4x128xf32> -> vector<4x128xf32>
    %283 = vector.broadcast %9 : vector<1x128xf32> to vector<4x128xf32>
    %284 = arith.addf %282, %283 : vector<4x128xf32>
    %285 = math.tanh %284 : vector<4x128xf32>
    %286 = arith.select %15, %285, %284 : vector<4x128xi1>, vector<4x128xf32>
    %c16 = arith.constant 16 : index
    %c0_53 = arith.constant 0 : index
    %287 = vector.load %arg7[%c16, %c0_53] : memref<32x128xf32, #tpu.memory_space<vmem>>, vector<4x128xf32>
    tpu.vector_store %arg7[%c16, %c0_53], %286 {strides = array<i32>} : memref<32x128xf32, #tpu.memory_space<vmem>>, vector<4x128xf32>,
    %288 = tpu.concatenate %263, %281 in 1 : vector<4x32xf32>, vector<4x32xf32> -> vector<4x64xf32>
    %cst_54 = arith.constant dense<0.000000e+00> : vector<4x256xf32>
    %289 = tpu.matmul %288, %6, %cst_54 {dimension_numbers = #tpu.dot_dimension_numbers<[1], [0], [0], [1], [0, 0, 1, 1], [], []>} : vector<4x64xf32>, vector<64x256xf32>, vector<4x256xf32> -> vector<4x256xf32>
    %290 = vector.broadcast %7 : vector<1x256xf32> to vector<4x256xf32>
    %291 = arith.addf %289, %290 : vector<4x256xf32>
    %292 = vector.extract_strided_slice %5 {offsets = [24, 0], sizes = [4, 96], strides = [1, 1]} : vector<32x96xf32> to vector<4x96xf32>
    %293 = vector.extract_strided_slice %292 {offsets = [0, 0], sizes = [4, 64], strides = [1, 1]} : vector<4x96xf32> to vector<4x64xf32>
    %294 = vector.extract_strided_slice %291 {offsets = [0, 0], sizes = [4, 64], strides = [1, 1]} : vector<4x256xf32> to vector<4x64xf32>
    %295 = arith.addf %293, %294 : vector<4x64xf32>
    %296 = arith.negf %295 : vector<4x64xf32>
    %297 = math.exp %296 : vector<4x64xf32>
    %cst_55 = arith.constant 1.000000e+00 : f32
    %298 = vector.broadcast %cst_55 : f32 to vector<4x64xf32>
    %299 = arith.addf %298, %297 : vector<4x64xf32>
    %300 = arith.divf %298, %299 : vector<4x64xf32>
    %301 = vector.extract_strided_slice %300 {offsets = [0, 0], sizes = [4, 32], strides = [1, 1]} : vector<4x64xf32> to vector<4x32xf32>
    %302 = vector.extract_strided_slice %300 {offsets = [0, 32], sizes = [4, 32], strides = [1, 1]} : vector<4x64xf32> to vector<4x32xf32>
    %303 = vector.extract_strided_slice %292 {offsets = [0, 64], sizes = [4, 32], strides = [1, 1]} : vector<4x96xf32> to vector<4x32xf32>
    %304 = vector.extract_strided_slice %291 {offsets = [0, 64], sizes = [4, 32], strides = [1, 1]} : vector<4x256xf32> to vector<4x32xf32>
    %305 = arith.mulf %301, %304 : vector<4x32xf32>
    %306 = arith.addf %303, %305 : vector<4x32xf32>
    %307 = math.tanh %306 : vector<4x32xf32>
    %cst_56 = arith.constant 1.000000e+00 : f32
    %308 = vector.broadcast %cst_56 : f32 to vector<4x32xf32>
    %309 = arith.subf %308, %302 : vector<4x32xf32>
    %310 = arith.mulf %309, %307 : vector<4x32xf32>
    %311 = arith.mulf %302, %263 : vector<4x32xf32>
    %312 = arith.addf %310, %311 : vector<4x32xf32>
    %313 = vector.extract_strided_slice %291 {offsets = [0, 128], sizes = [4, 64], strides = [1, 1]} : vector<4x256xf32> to vector<4x64xf32>
    %314 = arith.negf %313 : vector<4x64xf32>
    %315 = math.exp %314 : vector<4x64xf32>
    %cst_57 = arith.constant 1.000000e+00 : f32
    %316 = vector.broadcast %cst_57 : f32 to vector<4x64xf32>
    %317 = arith.addf %316, %315 : vector<4x64xf32>
    %318 = arith.divf %316, %317 : vector<4x64xf32>
    %319 = vector.extract_strided_slice %318 {offsets = [0, 0], sizes = [4, 32], strides = [1, 1]} : vector<4x64xf32> to vector<4x32xf32>
    %320 = vector.extract_strided_slice %318 {offsets = [0, 32], sizes = [4, 32], strides = [1, 1]} : vector<4x64xf32> to vector<4x32xf32>
    %321 = vector.extract_strided_slice %291 {offsets = [0, 192], sizes = [4, 32], strides = [1, 1]} : vector<4x256xf32> to vector<4x32xf32>
    %322 = vector.extract_strided_slice %291 {offsets = [0, 224], sizes = [4, 32], strides = [1, 1]} : vector<4x256xf32> to vector<4x32xf32>
    %323 = arith.mulf %319, %322 : vector<4x32xf32>
    %324 = arith.addf %321, %323 : vector<4x32xf32>
    %325 = math.tanh %324 : vector<4x32xf32>
    %cst_58 = arith.constant 1.000000e+00 : f32
    %326 = vector.broadcast %cst_58 : f32 to vector<4x32xf32>
    %327 = arith.subf %326, %320 : vector<4x32xf32>
    %328 = arith.mulf %327, %325 : vector<4x32xf32>
    %329 = arith.mulf %320, %281 : vector<4x32xf32>
    %330 = arith.addf %328, %329 : vector<4x32xf32>
    %cst_59 = arith.constant dense<0.000000e+00> : vector<4x128xf32>
    %331 = tpu.matmul %330, %8, %cst_59 {dimension_numbers = #tpu.dot_dimension_numbers<[1], [0], [0], [1], [0, 0, 1, 1], [], []>} : vector<4x32xf32>, vector<32x128xf32>, vector<4x128xf32> -> vector<4x128xf32>
    %332 = vector.broadcast %9 : vector<1x128xf32> to vector<4x128xf32>
    %333 = arith.addf %331, %332 : vector<4x128xf32>
    %334 = math.tanh %333 : vector<4x128xf32>
    %335 = arith.select %15, %334, %333 : vector<4x128xi1>, vector<4x128xf32>
    %c20 = arith.constant 20 : index
    %c0_60 = arith.constant 0 : index
    %336 = vector.load %arg7[%c20, %c0_60] : memref<32x128xf32, #tpu.memory_space<vmem>>, vector<4x128xf32>
    tpu.vector_store %arg7[%c20, %c0_60], %335 {strides = array<i32>} : memref<32x128xf32, #tpu.memory_space<vmem>>, vector<4x128xf32>,
    %337 = tpu.concatenate %312, %330 in 1 : vector<4x32xf32>, vector<4x32xf32> -> vector<4x64xf32>
    %cst_61 = arith.constant dense<0.000000e+00> : vector<4x256xf32>
    %338 = tpu.matmul %337, %6, %cst_61 {dimension_numbers = #tpu.dot_dimension_numbers<[1], [0], [0], [1], [0, 0, 1, 1], [], []>} : vector<4x64xf32>, vector<64x256xf32>, vector<4x256xf32> -> vector<4x256xf32>
    %339 = vector.broadcast %7 : vector<1x256xf32> to vector<4x256xf32>
    %340 = arith.addf %338, %339 : vector<4x256xf32>
    %341 = vector.extract_strided_slice %5 {offsets = [28, 0], sizes = [4, 96], strides = [1, 1]} : vector<32x96xf32> to vector<4x96xf32>
    %342 = vector.extract_strided_slice %341 {offsets = [0, 0], sizes = [4, 64], strides = [1, 1]} : vector<4x96xf32> to vector<4x64xf32>
    %343 = vector.extract_strided_slice %340 {offsets = [0, 0], sizes = [4, 64], strides = [1, 1]} : vector<4x256xf32> to vector<4x64xf32>
    %344 = arith.addf %342, %343 : vector<4x64xf32>
    %345 = arith.negf %344 : vector<4x64xf32>
    %346 = math.exp %345 : vector<4x64xf32>
    %cst_62 = arith.constant 1.000000e+00 : f32
    %347 = vector.broadcast %cst_62 : f32 to vector<4x64xf32>
    %348 = arith.addf %347, %346 : vector<4x64xf32>
    %349 = arith.divf %347, %348 : vector<4x64xf32>
    %350 = vector.extract_strided_slice %349 {offsets = [0, 0], sizes = [4, 32], strides = [1, 1]} : vector<4x64xf32> to vector<4x32xf32>
    %351 = vector.extract_strided_slice %349 {offsets = [0, 32], sizes = [4, 32], strides = [1, 1]} : vector<4x64xf32> to vector<4x32xf32>
    %352 = vector.extract_strided_slice %341 {offsets = [0, 64], sizes = [4, 32], strides = [1, 1]} : vector<4x96xf32> to vector<4x32xf32>
    %353 = vector.extract_strided_slice %340 {offsets = [0, 64], sizes = [4, 32], strides = [1, 1]} : vector<4x256xf32> to vector<4x32xf32>
    %354 = arith.mulf %350, %353 : vector<4x32xf32>
    %355 = arith.addf %352, %354 : vector<4x32xf32>
    %356 = math.tanh %355 : vector<4x32xf32>
    %cst_63 = arith.constant 1.000000e+00 : f32
    %357 = vector.broadcast %cst_63 : f32 to vector<4x32xf32>
    %358 = arith.subf %357, %351 : vector<4x32xf32>
    %359 = arith.mulf %358, %356 : vector<4x32xf32>
    %360 = arith.mulf %351, %312 : vector<4x32xf32>
    %361 = arith.addf %359, %360 : vector<4x32xf32>
    %362 = vector.extract_strided_slice %340 {offsets = [0, 128], sizes = [4, 64], strides = [1, 1]} : vector<4x256xf32> to vector<4x64xf32>
    %363 = arith.negf %362 : vector<4x64xf32>
    %364 = math.exp %363 : vector<4x64xf32>
    %cst_64 = arith.constant 1.000000e+00 : f32
    %365 = vector.broadcast %cst_64 : f32 to vector<4x64xf32>
    %366 = arith.addf %365, %364 : vector<4x64xf32>
    %367 = arith.divf %365, %366 : vector<4x64xf32>
    %368 = vector.extract_strided_slice %367 {offsets = [0, 0], sizes = [4, 32], strides = [1, 1]} : vector<4x64xf32> to vector<4x32xf32>
    %369 = vector.extract_strided_slice %367 {offsets = [0, 32], sizes = [4, 32], strides = [1, 1]} : vector<4x64xf32> to vector<4x32xf32>
    %370 = vector.extract_strided_slice %340 {offsets = [0, 192], sizes = [4, 32], strides = [1, 1]} : vector<4x256xf32> to vector<4x32xf32>
    %371 = vector.extract_strided_slice %340 {offsets = [0, 224], sizes = [4, 32], strides = [1, 1]} : vector<4x256xf32> to vector<4x32xf32>
    %372 = arith.mulf %368, %371 : vector<4x32xf32>
    %373 = arith.addf %370, %372 : vector<4x32xf32>
    %374 = math.tanh %373 : vector<4x32xf32>
    %cst_65 = arith.constant 1.000000e+00 : f32
    %375 = vector.broadcast %cst_65 : f32 to vector<4x32xf32>
    %376 = arith.subf %375, %369 : vector<4x32xf32>
    %377 = arith.mulf %376, %374 : vector<4x32xf32>
    %378 = arith.mulf %369, %330 : vector<4x32xf32>
    %379 = arith.addf %377, %378 : vector<4x32xf32>
    %cst_66 = arith.constant dense<0.000000e+00> : vector<4x128xf32>
    %380 = tpu.matmul %379, %8, %cst_66 {dimension_numbers = #tpu.dot_dimension_numbers<[1], [0], [0], [1], [0, 0, 1, 1], [], []>} : vector<4x32xf32>, vector<32x128xf32>, vector<4x128xf32> -> vector<4x128xf32>
    %381 = vector.broadcast %9 : vector<1x128xf32> to vector<4x128xf32>
    %382 = arith.addf %380, %381 : vector<4x128xf32>
    %383 = math.tanh %382 : vector<4x128xf32>
    %384 = arith.select %15, %383, %382 : vector<4x128xi1>, vector<4x128xf32>
    %c24 = arith.constant 24 : index
    %c0_67 = arith.constant 0 : index
    %385 = vector.load %arg7[%c24, %c0_67] : memref<32x128xf32, #tpu.memory_space<vmem>>, vector<4x128xf32>
    tpu.vector_store %arg7[%c24, %c0_67], %384 {strides = array<i32>} : memref<32x128xf32, #tpu.memory_space<vmem>>, vector<4x128xf32>,
    %386 = tpu.concatenate %361, %379 in 1 : vector<4x32xf32>, vector<4x32xf32> -> vector<4x64xf32>
    %cst_68 = arith.constant dense<0.000000e+00> : vector<4x256xf32>
    %387 = tpu.matmul %386, %6, %cst_68 {dimension_numbers = #tpu.dot_dimension_numbers<[1], [0], [0], [1], [0, 0, 1, 1], [], []>} : vector<4x64xf32>, vector<64x256xf32>, vector<4x256xf32> -> vector<4x256xf32>
    %388 = vector.broadcast %7 : vector<1x256xf32> to vector<4x256xf32>
    %389 = arith.addf %387, %388 : vector<4x256xf32>
    %390 = vector.extract_strided_slice %389 {offsets = [0, 128], sizes = [4, 64], strides = [1, 1]} : vector<4x256xf32> to vector<4x64xf32>
    %391 = arith.negf %390 : vector<4x64xf32>
    %392 = math.exp %391 : vector<4x64xf32>
    %cst_69 = arith.constant 1.000000e+00 : f32
    %393 = vector.broadcast %cst_69 : f32 to vector<4x64xf32>
    %394 = arith.addf %393, %392 : vector<4x64xf32>
    %395 = arith.divf %393, %394 : vector<4x64xf32>
    %396 = vector.extract_strided_slice %395 {offsets = [0, 0], sizes = [4, 32], strides = [1, 1]} : vector<4x64xf32> to vector<4x32xf32>
    %397 = vector.extract_strided_slice %395 {offsets = [0, 32], sizes = [4, 32], strides = [1, 1]} : vector<4x64xf32> to vector<4x32xf32>
    %398 = vector.extract_strided_slice %389 {offsets = [0, 192], sizes = [4, 32], strides = [1, 1]} : vector<4x256xf32> to vector<4x32xf32>
    %399 = vector.extract_strided_slice %389 {offsets = [0, 224], sizes = [4, 32], strides = [1, 1]} : vector<4x256xf32> to vector<4x32xf32>
    %400 = arith.mulf %396, %399 : vector<4x32xf32>
    %401 = arith.addf %398, %400 : vector<4x32xf32>
    %402 = math.tanh %401 : vector<4x32xf32>
    %cst_70 = arith.constant 1.000000e+00 : f32
    %403 = vector.broadcast %cst_70 : f32 to vector<4x32xf32>
    %404 = arith.subf %403, %397 : vector<4x32xf32>
    %405 = arith.mulf %404, %402 : vector<4x32xf32>
    %406 = arith.mulf %397, %379 : vector<4x32xf32>
    %407 = arith.addf %405, %406 : vector<4x32xf32>
    %cst_71 = arith.constant dense<0.000000e+00> : vector<4x128xf32>
    %408 = tpu.matmul %407, %8, %cst_71 {dimension_numbers = #tpu.dot_dimension_numbers<[1], [0], [0], [1], [0, 0, 1, 1], [], []>} : vector<4x32xf32>, vector<32x128xf32>, vector<4x128xf32> -> vector<4x128xf32>
    %409 = vector.broadcast %9 : vector<1x128xf32> to vector<4x128xf32>
    %410 = arith.addf %408, %409 : vector<4x128xf32>
    %411 = math.tanh %410 : vector<4x128xf32>
    %412 = arith.select %15, %411, %410 : vector<4x128xi1>, vector<4x128xf32>
    %c28 = arith.constant 28 : index
    %c0_72 = arith.constant 0 : index
    %413 = vector.load %arg7[%c28, %c0_72] : memref<32x128xf32, #tpu.memory_space<vmem>>, vector<4x128xf32>
    tpu.vector_store %arg7[%c28, %c0_72], %412 {strides = array<i32>} : memref<32x128xf32, #tpu.memory_space<vmem>>, vector<4x128xf32>,
    %c0_73 = arith.constant 0 : index
    %c0_74 = arith.constant 0 : index
    %c0_75 = arith.constant 0 : index
    %414 = vector.load %arg8[%c0_73, %c0_74, %c0_75] : memref<2x4x32xf32, #tpu.memory_space<vmem>>, vector<1x4x32xf32>
    %415 = vector.shape_cast %414 : vector<1x4x32xf32> to vector<4x32xf32>
    %416 = vector.shape_cast %361 : vector<4x32xf32> to vector<1x4x32xf32>
    tpu.vector_store %arg8[%c0_73, %c0_74, %c0_75], %416 {strides = array<i32>} : memref<2x4x32xf32, #tpu.memory_space<vmem>>, vector<1x4x32xf32>,
    %c1 = arith.constant 1 : index
    %c0_76 = arith.constant 0 : index
    %c0_77 = arith.constant 0 : index
    %417 = vector.load %arg8[%c1, %c0_76, %c0_77] : memref<2x4x32xf32, #tpu.memory_space<vmem>>, vector<1x4x32xf32>
    %418 = vector.shape_cast %417 : vector<1x4x32xf32> to vector<4x32xf32>
    %419 = vector.shape_cast %407 : vector<4x32xf32> to vector<1x4x32xf32>
    tpu.vector_store %arg8[%c1, %c0_76, %c0_77], %419 {strides = array<i32>} : memref<2x4x32xf32, #tpu.memory_space<vmem>>, vector<1x4x32xf32>,
    return
  }
}

</mosaic_0001>

<bundles_post_ra>
// kernel: gaussian_writing_gru_forward.1
= control target key start
LH: loop header
LB: loop body
LE: loop exit
PB: predicated region body
PF: predicated region fallthrough
CT: control target
= control target key end

     0   :  { %14 = vsyncpa [#allocation3], 0  ;;  %s3072_s0 = inlined_call_operand.vmem [shape: f32[32,3], index: 0, kind: input, shape index: {}]   ;;  %s3073_s1 = inlined_call_operand.vmem [shape: f32[3,96], index: 1, kind: input, shape index: {}]   ;;  %s3074_s2 = inlined_call_operand.vmem [shape: f32[1,96], index: 2, kind: input, shape index: {}]   ;;  %s3075_s3 = inlined_call_operand.hbm [shape: f32[64,256], index: 3, kind: input, shape index: {}]   ;;  %s3076_s4 = inlined_call_operand.vmem [shape: f32[1,256], index: 4, kind: input, shape index: {}]   ;;  %s3077_s5 = inlined_call_operand.vmem [shape: f32[32,128], index: 5, kind: input, shape index: {}]   ;;  %s3078_s6 = inlined_call_operand.vmem [shape: f32[1,128], index: 6, kind: input, shape index: {}]   ;;  %s3079_s7 = inlined_call_operand.vmem [shape: f32[32,128], index: 7, kind: output, shape index: {0}]   ;;  %s3080_s8 = inlined_call_operand.hbm [shape: f32[2,4,32], index: 8, kind: output, shape index: {1}]  }
   0x1   :  { %15 = vsyncpa [#allocation4], 0  ;;  %s2543_s27 = smov [#allocation2]   ;;  %s2495_s9 = scalar_lea.hbm %s3075_s3, 2048 }
   0x2   :  { %s27_s28 = sshll.u32 %s2543_s27, 4  ;;  %p2496_p0 = scmp.ne.s32.totalorder %s3075_s3, %s2495_s9  ;;  %s28_s28 = int_to_ptr.vmem [resolvable:$true] %s27_s28 }
   0x3   :  { %p2499_p1 = scmp.lt.u32.totalorder %s2495_s9, %s3075_s3 }
   0x5   :  { %p2501_p2 = pnand %p2499_p1, %p2496_p0 }
   0x7   :  { %2504 = shalt.err (!%p2501_p2)
}
   0x8   :  { %s2505_s14 = scalar_lea.vmem %s28_s28, 2048  ;;  %p2510_p4 = scmp.lt.s32.totalorder %s28_s28, %s28_s28 }
   0x9   :  { %p2506_p3 = scmp.ne.s32.totalorder %s28_s28, %s2505_s14  ;;  %p2511_p5 = scmp.lt.s32.totalorder %s2505_s14, %s2505_s14 }
   0xb   :  { %p2512_p6 = por %p2511_p5, %p2510_p4 }
   0xd   :  { %p2513_p7 = pnand %p2512_p6, %p2506_p3 }
   0xf   :  { %2516 = shalt.err (!%p2513_p7)
}
  0x10   :  { %s2544_s15 = smov 256   ;;  %s2545_s16 = smov 16  }
  0x11   :  { %33 = dma.hbm_to_vmem [thread:$0]  %s3075_s3, 2048, %s28_s28, [#allocation3], %s2544_s15, %s2544_s15, %s2545_s16  }
  0x12   :  { %2539 = dma.done.wait [#allocation3], 2048  }
  0x13   :  { %2540 = vsyncadd [#allocation3], 4294965248  ;;  %v2546_v0 = vmov 0.0   ;;  %v158_v1 = vld [vmem:[#allocation2 + $0x8] sm:$0xff]  ;;  %v160_v2 = vld [vmem:[#allocation2 + $0x18] sm:$0xff]  ;;  %vm68_vm0 = vcmask 1042432   ;;  %v179_v28 = vlaneseq }
  0x14   :  { %263 = vmatprep.mubr.f32.mxu1 %v2546_v0  ;;  %v157_v3 = vld [vmem:[#allocation2] sm:$0xff]  ;;  %v2612_v4 = vpack.c.bf16 %v160_v2, %v158_v1  ;;  %v159_v5 = vld [vmem:[#allocation2 + $0x10] sm:$0xff]  ;;  %v162_v6 = vld [vmem:[#allocation2 + $0x28] sm:$0xff]  ;;  %vm55_vm1 = vcmask 23552   ;;  %s2547_s25 = smov 64   ;;  %s2548_s30 = smov 96  }
  0x15   :  { %v164_v7 = vld [vmem:[#allocation2 + $0x38] sm:$0xff]  ;;  %v2614_v8 = vpack.c.bf16 %v159_v5, %v157_v3  ;;  %v161_v10 = vld [vmem:[#allocation2 + $0x20] sm:$0xff]  ;;  %v163_v11 = vld [vmem:[#allocation2 + $0x30] sm:$0xff]  ;;  %v186_v31 = vshrl.u32 %v179_v28, 7  ;;  %vm299_vm2 = vcmask 261120   ;;  %vm195_vm3 = vcmask 523264  }
  0x16   :  { %v2616_v9 = vpack.c.bf16 %v164_v7, %v162_v6  ;;  %v166_v12 = vld [vmem:[#allocation2 + $0x48] sm:$0xff]  ;;  %2181 = vmatprep.subr.bf16.mxu1 %v2612_v4  ;;  %v168_v13 = vld [vmem:[#allocation2 + $0x58] sm:$0xff]  ;;  %v2620_v14 = vpack.c.bf16 %v163_v11, %v161_v10  ;;  %v47_v15 = vld [vmem:[%s3073_s1] sm:$0x7]  ;;  %vm2551_vm4 = vmmov 0   ;;  %vm1973_vm8 = vcmask 261124  }
  0x17   :  { %2183 = vmatpush1.bf16.msra.mxu1 %v2614_v8  ;;  %v2626_v16 = vpack.c.bf16 %v168_v13, %v166_v12  ;;  %v165_v17 = vld [vmem:[#allocation2 + $0x40] sm:$0xff]  ;;  %v167_v18 = vld [vmem:[#allocation2 + $0x50] sm:$0xff]  ;;  %2084 = vmatprep.subr.msk.mxu0 %vm68_vm0, %v47_v15  ;;  %v170_v20 = vld [vmem:[#allocation2 + $0x68] sm:$0xff]  ;;  %v187_v32 = vsub.s32 0, %v186_v31  ;;  %v191_v61 = vsub.s32 1, %v186_v31  ;;  %vm1977_vm9 = vcmask 257024  }
  0x18   :  { %2185 = vmatprep.subr.bf16.mxu1 %v2616_v9  ;;  %v43_v19 = vld [vmem:[%s3072_s0] sm:$0xff]  ;;  %v172_v21 = vld [vmem:[#allocation2 + $0x78] sm:$0xff]  ;;  %2085 = vmatpush3.msk.msra.mxu0 %vm68_vm0, %v47_v15  ;;  %v44_v22 = vld [vmem:[%s3072_s0 + $0x8] sm:$0xff]  ;;  %v2638_v23 = vpack.c.bf16 %v167_v18, %v165_v17  ;;  %s2552_s28 = smov [#allocation5]  }
  0x19   :  { %2086 = vmatprep.mubr.msk.f32.mxu0 %vm55_vm1, %v43_v19  ;;  %2197 = vmatprep.subr.bf16.mxu0 %v2612_v4  ;;  %v2642_v24 = vpack.c.bf16 %v172_v21, %v170_v20  ;;  %v169_v25 = vld [vmem:[#allocation2 + $0x60] sm:$0xff]  ;;  %v171_v26 = vld [vmem:[#allocation2 + $0x70] sm:$0xff]  ;;  %v46_v50 = vld [vmem:[%s3072_s0 + $0x18] sm:$0xff]  ;;  %s1986_s29 = sshll.u32 %s2552_s28, 4  ;;  %s1987_s29 = int_to_ptr.vmem [resolvable:$true] %s1986_s29 }
  0x1a   :  { %2087 = vmatmul.mubr.msk.f32.vlgmr.msra.gmra.mrb[0].mxu0 %vm55_vm1, %v44_v22  ;;  %v2646_v27 = vpack.c.bf16 %v171_v26, %v169_v25  ;;  %v173_v33 = vld [vmem:[%s3076_s4] sm:$0x3]  ;;  %v45_v49 = vld [vmem:[%s3072_s0 + $0x10] sm:$0xff]  ;;  %s2549_s0 = smov 32   ;;  %p2522_p9 = scmp.lt.s32.totalorder %s1987_s29, %s1987_s29 }
  0x1b   :  { %2187 = vmatpush1.bf16.msra.mxu1 %v2620_v14  ;;  %2199 = vmatpush1.bf16.msra.mxu0 %v2614_v8  ;;  %v2663_v34 = vrot.slane %v173_v33, %v187_v32  ;;  %v2670_v38 = vld [vmem:[%s3074_s2] ss:$0 sm:$0xff]  ;;  %v2703_v62 = vrot.slane %v173_v33, %v191_v61 }
  0x1c   :  { %2189 = vmatprep.subr.bf16.mxu1 %v2626_v16  ;;  %2201 = vmatprep.subr.bf16.mxu0 %v2616_v9 }
  0x1d   :  { %2089 = vmatprep.mubr.msk.f32.mxu0 %vm55_vm1, %v45_v49 }
  0x1e   :  { %2090 = vmatmul.mubr.msk.f32.gmra.mrb[2].mxu0 %vm55_vm1, %v46_v50 }
  0x1f   :  { %2191 = vmatpush1.bf16.msra.mxu1 %v2638_v23  ;;  %2203 = vmatpush1.bf16.msra.mxu0 %v2620_v14 }
  0x20   :  { %2193 = vmatprep.subr.bf16.mxu1 %v2642_v24  ;;  %2205 = vmatprep.subr.bf16.mxu0 %v2626_v16 }
  0x21   :  { %368 = vmatprep.mubr.f32.mxu0 %v2546_v0 }
  0x23   :  { %2195 = vmatpush1.bf16.msra.mxu1 %v2646_v27  ;;  %2207 = vmatpush1.bf16.msra.mxu0 %v2638_v23 }
  0x24   :  { %2209 = vmatprep.subr.bf16.mxu0 %v2642_v24 }
  0x26   :  { %264 = vmatmul.mubr.f32.vlgmr.msra.gmra.mrb[0].mxu1 %v2546_v0 }
  0x27   :  { %2211 = vmatpush1.bf16.msra.mxu0 %v2646_v27  ;;  %2100 = vmatprep.mubr.msk.f32.mxu1 %vm2551_vm4, %v2546_v0 }
  0x28   :  { %2219 = vmatprep.subr.bf16.mxu0 %v2612_v4 }
  0xed   :  { %v2657_v29 = vpop.f32.mrb[0].mxu0 }
  0xee   :  { %v138_v30 = vpop.f32.mrb[1].mxu0 }
  0xef   :  { %v2673_v39 = vadd.f32 %v2670_v38, %v138_v30 }
  0xf1   :  { %v2689_v57 = vpop.f32.mrb[2].mxu0 }
  0xf2   :  { %v2691_v58 = vpop.f32.mrb[3].mxu0 }
  0xf9   :  { %v265_v35 = vpop.f32.mrb[0].mxu1 }
  0xfa   :  { %v266_v36 = vadd.f32 %v265_v35, %v2663_v34  ;;  %v267_v37 = vpop.f32.mrb[1].mxu1 }
  0xfc   :  { %277 = vrot.lane.b32.xlu0 %v266_v36, %s2547_s25  ;;  %v269_v40 = vadd.f32 %v266_v36, %v2673_v39 }
  0xfe   :  { %v2006_v41 = vmul.f32 -1.442695, %v269_v40 }
 0x100   :  { %2383 = vpow2.f32 %v2006_v41 }
 0x10a   :  { %v2384_v42 = vpop.eup %2383 }
 0x10b   :  { %v273_v43 = vadd.f32 1.0, %v2384_v42 }
 0x10d   :  { %2385 = vrcp.f32 %v273_v43 }
 0x117   :  { %v2386_v44 = vpop.eup %2385 }
 0x118   :  { %v287_v52 = vsub.f32 1.0, %v2386_v44  ;;  %v293_v54 = vmul.f32 0.0, %v2386_v44 }
 0x16e   :  { %v278_v45 = vpop.permute.xlu0 %277 }
 0x16f   :  { %v280_v46 = vmul.f32 %v2386_v44, %v278_v45 }
 0x171   :  { %282 = vrot.lane.b32.xlu0 %v280_v46, %s2547_s25 }
 0x1e3   :  { %v283_v47 = vpop.permute.xlu0 %282 }
 0x1e4   :  { %v285_v48 = vadd.f32 %v283_v47, %v2673_v39 }
 0x1e6   :  { %2387 = vtanh.f32 %v285_v48 }
 0x1f0   :  { %v2388_v51 = vpop.eup %2387 }
 0x1f1   :  { %289 = vrot.lane.b32.xlu1 %v2388_v51, %s2548_s30 }
 0x263   :  { %v290_v53 = vpop.permute.xlu1 %289 }
 0x264   :  { %v292_v55 = vmul.f32 %v290_v53, %v287_v52 }
 0x266   :  { %v294_v56 = vadd.f32 %v293_v54, %v292_v55  ;;  %v2730_v55 = vadd.f32 %v2657_v29, %v2670_v38  ;;  %v174_v29 = vld [vmem:[%s3077_s5] sm:$0xff] }
 0x268   :  { %296 = vrot.lane.b32.xlu1 %v294_v56, %s2548_s30  ;;  %v401_v35 = vrot.slane %v294_v56, 4 }
 0x2da   :  { %v297_v59 = vpop.permute.xlu1 %296 }
 0x2db   :  { %v300_v60 = vsel %vm299_vm2, %v297_v59, 0.0 }
 0x2dc   :  { %2007 = vmatmul.mubr.msk.f32.vlgmr.msra.gmra.mrb[4].mxu0 %vm195_vm3, %v300_v60 }
 0x2dd   :  { %2221 = vmatpush1.bf16.msra.mxu0 %v2614_v8  ;;  %589 = vmatprep.mubr.f32.mxu0 %v2546_v0 }
 0x2de   :  { %2223 = vmatprep.subr.bf16.mxu0 %v2616_v9 }
 0x2e1   :  { %2225 = vmatpush1.bf16.msra.mxu0 %v2620_v14 }
 0x2e2   :  { %2227 = vmatprep.subr.bf16.mxu0 %v2626_v16 }
 0x2e5   :  { %2229 = vmatpush1.bf16.msra.mxu0 %v2638_v23 }
 0x2e6   :  { %2231 = vmatprep.subr.bf16.mxu0 %v2642_v24 }
 0x2e9   :  { %2233 = vmatpush1.bf16.msra.mxu0 %v2646_v27 }
 0x3af   :  { %v370_v63 = vpop.f32.mrb[4].mxu0 }
 0x3b0   :  { %v371_v1 = vadd.f32 %v370_v63, %v2663_v34  ;;  %v372_v2 = vpop.f32.mrb[5].mxu0 }
 0x3b1   :  { %v373_v3 = vadd.f32 %v372_v2, %v2703_v62 }
 0x3b2   :  { %v376_v5 = vrot.slane %v371_v1, 4 }
 0x3b3   :  { %412 = vrot.lane.b32.xlu1 %v373_v3, %s2549_s0  ;;  %v2009_v7 = vmul.f32 -1.442695, %v373_v3 }
 0x3b4   :  { %385 = vrot.lane.b32.xlu0 %v376_v5, %s2547_s25  ;;  %v378_v6 = vadd.f32 %v376_v5, %v2673_v39 }
 0x3b5   :  { %2389 = vpow2.f32 %v2009_v7 }
 0x3b6   :  { %v2008_v10 = vmul.f32 -1.442695, %v378_v6 }
 0x3b8   :  { %2391 = vpow2.f32 %v2008_v10 }
 0x3bf   :  { %v2390_v11 = vpop.eup %2389 }
 0x3c0   :  { %v408_v13 = vadd.f32 1.0, %v2390_v11 }
 0x3c2   :  { %v2392_v12 = vpop.eup %2391  ;;  %2393 = vrcp.f32 %v408_v13  ;;  %v2550_v13 = vmov 0.0|0.0  }
 0x3c3   :  { %v382_v15 = vadd.f32 1.0, %v2392_v12  ;;  %v175_v12 = vld [vmem:[%s3077_s5 + $0x8] sm:$0xff]  ;;  %2212 = vmatprep.subr.bf16.mxu1 %v2550_v13  ;;  %2256 = vmatprep.subr.bf16.mxu0 %v2550_v13 }
 0x3c5   :  { %2395 = vrcp.f32 %v382_v15  ;;  %v2742_v15 = vpack.c.bf16 %v175_v12, %v174_v29 }
 0x3c7   :  { %2214 = vmatpush3.bf16.msra.mxu1 %v2742_v15 }
 0x3c8   :  { %2215 = vmatprep.subr.bf16.mxu1 %v2550_v13 }
 0x3cc   :  { %v2394_v17 = vpop.eup %2393 }
 0x3cd   :  { %v428_v45 = vmul.f32 0.0, %v2394_v17 }
 0x3cf   :  { %v2396_v19 = vpop.eup %2395 }
 0x3d0   :  { %v395_v36 = vsub.f32 1.0, %v2396_v19  ;;  %v403_v41 = vmul.f32 %v2396_v19, %v401_v35 }
 0x425   :  { %v413_v18 = vpop.permute.xlu1 %412 }
 0x426   :  { %v415_v20 = vmul.f32 %v2394_v17, %v413_v18  ;;  %v386_v21 = vpop.permute.xlu0 %385  ;;  %v176_v18 = vld [vmem:[%s3077_s5 + $0x10] sm:$0xff] }
 0x427   :  { %v388_v22 = vmul.f32 %v2396_v19, %v386_v21  ;;  %v177_v19 = vld [vmem:[%s3077_s5 + $0x18] sm:$0xff] }
 0x428   :  { %417 = vrot.lane.b32.xlu1 %v415_v20, %s2547_s25 }
 0x429   :  { %390 = vrot.lane.b32.xlu0 %v388_v22, %s2547_s25  ;;  %v2756_v22 = vpack.c.bf16 %v177_v19, %v176_v18 }
 0x42b   :  { %2217 = vmatpush3.bf16.msra.mxu1 %v2756_v22 }
 0x42c   :  { %2234 = vmatprep.subr.bf16.mxu1 %v2550_v13 }
 0x49a   :  { %v418_v25 = vpop.permute.xlu1 %417 }
 0x49b   :  { %v420_v26 = vadd.f32 %v418_v25, %v373_v3  ;;  %v391_v30 = vpop.permute.xlu0 %390 }
 0x49c   :  { %v393_v31 = vadd.f32 %v391_v30, %v2673_v39  ;;  %v422_v39 = vsub.f32 1.0, %v2394_v17 }
 0x49d   :  { %2397 = vtanh.f32 %v420_v26 }
 0x49e   :  { %2399 = vtanh.f32 %v393_v31 }
 0x4a7   :  { %v2398_v32 = vpop.eup %2397 }
 0x4a8   :  { %v2400_v33 = vpop.eup %2399  ;;  %424 = vrot.lane.b32.xlu1 %v2398_v32, %s2548_s30 }
 0x4a9   :  { %397 = vrot.lane.b32.xlu0 %v2400_v33, %s2548_s30 }
 0x51a   :  { %v425_v43 = vpop.permute.xlu1 %424 }
 0x51b   :  { %v398_v37 = vpop.permute.xlu0 %397  ;;  %v427_v44 = vmul.f32 %v425_v43, %v422_v39 }
 0x51c   :  { %v400_v40 = vmul.f32 %v398_v37, %v395_v36 }
 0x51d   :  { %v2719_v46 = vadd.f32 %v428_v45, %v427_v44 }
 0x51e   :  { %v2715_v42 = vadd.f32 %v403_v41, %v400_v40 }
 0x51f   :  { %v518_v47 = vrot.slane %v2719_v46, 4 }
 0x520   :  { %515 = vrot.lane.b32.xlu0 %v2715_v42, %s2548_s30  ;;  %v620_v31 = vrot.slane %v2715_v42, 4 }
 0x592   :  { %v516_v48 = vpop.permute.xlu0 %515 }
 0x593   :  { %v520_v49 = vsel %vm299_vm2, %v516_v48, %v518_v47  ;;  %v2809_v48 = vld [vmem:[%s3078_s6] ss:$0 sm:$0xff] }
 0x594   :  { %v522_v50 = vrot.slane %v520_v49, 4 }
 0x596   :  { %2012 = vmatmul.mubr.msk.f32.vlgmr.msra.gmra.mrb[6].mxu0 %vm195_vm3, %v522_v50 }
 0x597   :  { %2258 = vmatpush3.bf16.msra.mxu0 %v2742_v15  ;;  %2122 = vmatprep.mubr.msk.f32.mxu0 %vm2551_vm4, %v2546_v0 }
 0x598   :  { %2259 = vmatprep.subr.bf16.mxu0 %v2550_v13 }
 0x59b   :  { %2261 = vmatpush3.bf16.msra.mxu0 %v2756_v22 }
 0x59c   :  { %2263 = vmatprep.subr.bf16.mxu0 %v2612_v4 }
 0x669   :  { %v591_v51 = vpop.f32.mrb[6].mxu0 }
 0x66a   :  { %v592_v52 = vadd.f32 %v591_v51, %v2663_v34  ;;  %v593_v53 = vpop.f32.mrb[7].mxu0 }
 0x66b   :  { %v594_v54 = vadd.f32 %v593_v53, %v2703_v62 }
 0x66c   :  { %604 = vrot.lane.b32.xlu0 %v592_v52, %s2547_s25  ;;  %v596_v56 = vadd.f32 %v592_v52, %v2730_v55  ;;  %v180_v52 = vand.u32 127, %v179_v28 }
 0x66d   :  { %631 = vrot.lane.b32.xlu1 %v594_v54, %s2549_s0  ;;  %v2014_v60 = vmul.f32 -1.442695, %v594_v54 }
 0x66e   :  { %v2013_v59 = vmul.f32 -1.442695, %v596_v56  ;;  %vm181_vm5 = vcmp.ge.s32.totalorder %v180_v52, 80  ;;  %vm182_vm6 = vcmp.lt.s32.totalorder %v180_v52, 100 }
 0x66f   :  { %vm2813_vm7 = vmand %vm181_vm5, %vm182_vm6 }
 0x670   :  { %2401 = vpow2.f32 %v2013_v59 }
 0x671   :  { %2403 = vpow2.f32 %v2014_v60 }
 0x67a   :  { %v2402_v61 = vpop.eup %2401 }
 0x67b   :  { %v2404_v63 = vpop.eup %2403  ;;  %v600_v1 = vadd.f32 1.0, %v2402_v61 }
 0x67c   :  { %v627_v2 = vadd.f32 1.0, %v2404_v63 }
 0x67d   :  { %2405 = vrcp.f32 %v600_v1 }
 0x67e   :  { %2407 = vrcp.f32 %v627_v2 }
 0x687   :  { %v2406_v3 = vpop.eup %2405 }
 0x688   :  { %v2408_v6 = vpop.eup %2407  ;;  %v614_v32 = vsub.f32 1.0, %v2406_v3  ;;  %v622_v37 = vmul.f32 %v2406_v3, %v620_v31 }
 0x689   :  { %v641_v35 = vsub.f32 1.0, %v2408_v6  ;;  %v647_v41 = vmul.f32 %v2408_v6, %v2719_v46 }
 0x6de   :  { %v605_v5 = vpop.permute.xlu0 %604 }
 0x6df   :  { %v607_v7 = vmul.f32 %v2406_v3, %v605_v5  ;;  %v632_v10 = vpop.permute.xlu1 %631 }
 0x6e0   :  { %v634_v11 = vmul.f32 %v2408_v6, %v632_v10 }
 0x6e1   :  { %609 = vrot.lane.b32.xlu0 %v607_v7, %s2547_s25 }
 0x6e2   :  { %636 = vrot.lane.b32.xlu1 %v634_v11, %s2547_s25 }
 0x753   :  { %v610_v17 = vpop.permute.xlu0 %609 }
 0x754   :  { %v612_v20 = vadd.f32 %v610_v17, %v2730_v55  ;;  %v637_v21 = vpop.permute.xlu1 %636 }
 0x755   :  { %v639_v25 = vadd.f32 %v637_v21, %v594_v54 }
 0x756   :  { %2409 = vtanh.f32 %v612_v20 }
 0x757   :  { %2411 = vtanh.f32 %v639_v25 }
 0x760   :  { %v2410_v26 = vpop.eup %2409 }
 0x761   :  { %v2412_v30 = vpop.eup %2411  ;;  %616 = vrot.lane.b32.xlu0 %v2410_v26, %s2548_s30 }
 0x762   :  { %643 = vrot.lane.b32.xlu1 %v2412_v30, %s2548_s30 }
 0x766   :  { %437 = vrot.lane.b32.xlu1 %v2719_v46, %s2548_s30 }
 0x7d3   :  { %v617_v33 = vpop.permute.xlu0 %616 }
 0x7d4   :  { %v619_v36 = vmul.f32 %v617_v33, %v614_v32  ;;  %v644_v40 = vpop.permute.xlu1 %643 }
 0x7d5   :  { %v646_v43 = vmul.f32 %v644_v40, %v641_v35 }
 0x7d6   :  { %v2772_v39 = vadd.f32 %v622_v37, %v619_v36 }
 0x7d7   :  { %v2774_v44 = vadd.f32 %v647_v41, %v646_v43 }
 0x7d8   :  { %v438_v45 = vpop.permute.xlu1 %437  ;;  %728 = vrot.lane.b32.xlu1 %v2772_v39, %s2548_s30  ;;  %v832_v41 = vrot.slane %v2772_v39, 4 }
 0x7d9   :  { %2101 = vmatmul.mubr.msk.f32.vlgmr.msra.gmra.mrb[2].mxu1 %vm299_vm2, %v438_v45  ;;  %650 = vrot.lane.b32.xlu0 %v2774_v44, %s2548_s30 }
 0x7da   :  { %2236 = vmatpush3.bf16.msra.mxu1 %v2742_v15  ;;  %2111 = vmatprep.mubr.msk.f32.mxu1 %vm2551_vm4, %v2546_v0 }
 0x7db   :  { %2237 = vmatprep.subr.bf16.mxu1 %v2550_v13 }
 0x7de   :  { %2239 = vmatpush3.bf16.msra.mxu1 %v2756_v22 }
 0x7df   :  { %2241 = vmatprep.subr.bf16.mxu1 %v2612_v4 }
 0x84a   :  { %v729_v46 = vpop.permute.xlu1 %728 }
 0x84b   :  { %v651_v42 = vpop.permute.xlu0 %650  ;;  %v731_v47 = vsel %vm299_vm2, %v729_v46, %v2774_v44 }
 0x84c   :  { %2112 = vmatmul.mubr.msk.f32.vlgmr.msra.gmra.mrb[4].mxu1 %vm299_vm2, %v651_v42 }
 0x84d   :  { %2243 = vmatpush1.bf16.msra.mxu1 %v2614_v8  ;;  %799 = vmatprep.mubr.f32.mxu1 %v2546_v0 }
 0x84e   :  { %2245 = vmatprep.subr.bf16.mxu1 %v2616_v9 }
 0x851   :  { %2247 = vmatpush1.bf16.msra.mxu1 %v2620_v14 }
 0x852   :  { %2249 = vmatprep.subr.bf16.mxu1 %v2626_v16 }
 0x855   :  { %2251 = vmatpush1.bf16.msra.mxu1 %v2638_v23 }
 0x856   :  { %2253 = vmatprep.subr.bf16.mxu1 %v2642_v24 }
 0x859   :  { %2255 = vmatpush1.bf16.msra.mxu1 %v2646_v27 }
 0x85a   :  { %2278 = vmatprep.subr.bf16.mxu1 %v2550_v13 }
 0x85c   :  { %2016 = vmatmul.mubr.msk.f32.vlgmr.msra.gmra.mrb[6].mxu1 %vm195_vm3, %v731_v47 }
 0x85d   :  { %2280 = vmatpush3.bf16.msra.mxu1 %v2742_v15  ;;  %2133 = vmatprep.mubr.msk.f32.mxu1 %vm2551_vm4, %v2546_v0 }
 0x85e   :  { %2281 = vmatprep.subr.bf16.mxu1 %v2550_v13 }
 0x861   :  { %2283 = vmatpush3.bf16.msra.mxu1 %v2756_v22 }
 0x862   :  { %2285 = vmatprep.subr.bf16.mxu1 %v2612_v4 }
 0x8ac   :  { %v507_v49 = vpop.f32.mrb[2].mxu1 }
 0x8ad   :  { %v508_v50 = vadd.f32 %v2809_v48, %v507_v49  ;;  %v2102_v51 = vpop.f32.mrb[3].mxu1 }
 0x8af   :  { %2413 = vtanh.f32 %v508_v50 }
 0x8b9   :  { %v2414_v54 = vpop.eup %2413 }
 0x8ba   :  { %v512_v56 = vsel %vm2813_vm7, %v2414_v54, %v508_v50 }
 0x8bb   :  { %513 = vst [vmem:[%s3079_s7] sm:$0xf] %v512_v56 }
 0x91f   :  { %v720_v59 = vpop.f32.mrb[4].mxu1 }
 0x920   :  { %v721_v60 = vadd.f32 %v2809_v48, %v720_v59  ;;  %v2113_v61 = vpop.f32.mrb[5].mxu1 }
 0x922   :  { %2415 = vtanh.f32 %v721_v60 }
 0x92c   :  { %v2416_v28 = vpop.eup %2415 }
 0x92d   :  { %v725_v63 = vsel %vm2813_vm7, %v2416_v28, %v721_v60 }
 0x92e   :  { %726 = vst [vmem:[%s3079_s7 + $0x4] sm:$0xf] %v725_v63 }
 0x92f   :  { %v801_v1 = vpop.f32.mrb[6].mxu1 }
 0x930   :  { %v802_v2 = vadd.f32 %v801_v1, %v2663_v34  ;;  %v803_v3 = vpop.f32.mrb[7].mxu1 }
 0x931   :  { %v804_v5 = vadd.f32 %v803_v3, %v2703_v62 }
 0x932   :  { %v807_v6 = vrot.slane %v802_v2, 4 }
 0x933   :  { %843 = vrot.lane.b32.xlu0 %v804_v5, %s2549_s0  ;;  %v2018_v10 = vmul.f32 -1.442695, %v804_v5 }
 0x934   :  { %816 = vrot.lane.b32.xlu1 %v807_v6, %s2547_s25  ;;  %v809_v7 = vadd.f32 %v807_v6, %v2730_v55  ;;  %v2879_v6 = vadd.f32 %v2670_v38, %v2691_v58 }
 0x935   :  { %2417 = vpow2.f32 %v2018_v10 }
 0x936   :  { %v2017_v11 = vmul.f32 -1.442695, %v809_v7 }
 0x938   :  { %2419 = vpow2.f32 %v2017_v11 }
 0x93f   :  { %v2418_v29 = vpop.eup %2417 }
 0x940   :  { %v839_v17 = vadd.f32 1.0, %v2418_v29 }
 0x942   :  { %v2420_v12 = vpop.eup %2419  ;;  %2421 = vrcp.f32 %v839_v17 }
 0x943   :  { %v813_v18 = vadd.f32 1.0, %v2420_v12 }
 0x945   :  { %2423 = vrcp.f32 %v813_v18 }
 0x94c   :  { %v2422_v19 = vpop.eup %2421 }
 0x94d   :  { %v853_v40 = vsub.f32 1.0, %v2422_v19  ;;  %v859_v42 = vmul.f32 %v2422_v19, %v2774_v44 }
 0x94f   :  { %v2424_v21 = vpop.eup %2423 }
 0x950   :  { %v826_v45 = vsub.f32 1.0, %v2424_v21  ;;  %v834_v50 = vmul.f32 %v2424_v21, %v832_v41 }
 0x9a5   :  { %v844_v20 = vpop.permute.xlu0 %843 }
 0x9a6   :  { %v846_v25 = vmul.f32 %v2422_v19, %v844_v20  ;;  %v817_v26 = vpop.permute.xlu1 %816 }
 0x9a7   :  { %v819_v30 = vmul.f32 %v2424_v21, %v817_v26 }
 0x9a8   :  { %848 = vrot.lane.b32.xlu0 %v846_v25, %s2547_s25 }
 0x9a9   :  { %821 = vrot.lane.b32.xlu1 %v819_v30, %s2547_s25 }
 0xa1a   :  { %v849_v31 = vpop.permute.xlu0 %848 }
 0xa1b   :  { %v851_v32 = vadd.f32 %v849_v31, %v804_v5  ;;  %v822_v33 = vpop.permute.xlu1 %821 }
 0xa1c   :  { %v824_v35 = vadd.f32 %v822_v33, %v2730_v55 }
 0xa1d   :  { %2425 = vtanh.f32 %v851_v32 }
 0xa1e   :  { %2427 = vtanh.f32 %v824_v35 }
 0xa27   :  { %v2426_v36 = vpop.eup %2425 }
 0xa28   :  { %v2428_v37 = vpop.eup %2427  ;;  %855 = vrot.lane.b32.xlu0 %v2426_v36, %s2548_s30 }
 0xa29   :  { %828 = vrot.lane.b32.xlu1 %v2428_v37, %s2548_s30 }
 0xa9a   :  { %v856_v43 = vpop.permute.xlu0 %855 }
 0xa9b   :  { %v858_v46 = vmul.f32 %v856_v43, %v853_v40  ;;  %v829_v47 = vpop.permute.xlu1 %828 }
 0xa9c   :  { %v831_v49 = vmul.f32 %v829_v47, %v826_v45 }
 0xa9d   :  { %v2840_v55 = vadd.f32 %v859_v42, %v858_v46 }
 0xa9e   :  { %v2842_v51 = vadd.f32 %v834_v50, %v831_v49 }
 0xa9f   :  { %862 = vrot.lane.b32.xlu0 %v2840_v55, %s2548_s30  ;;  %v943_v44 = vrot.slane %v2840_v55, 4 }
 0xaa0   :  { %940 = vrot.lane.b32.xlu1 %v2842_v51, %s2548_s30  ;;  %v1045_v37 = vrot.slane %v2842_v51, 4 }
 0xb11   :  { %v863_v52 = vpop.permute.xlu0 %862 }
 0xb12   :  { %2123 = vmatmul.mubr.msk.f32.vlgmr.msra.gmra.mrb[8].mxu0 %vm299_vm2, %v863_v52  ;;  %v941_v39 = vpop.permute.xlu1 %940 }
 0xb13   :  { %2265 = vmatpush1.bf16.msra.mxu0 %v2614_v8  ;;  %1014 = vmatprep.mubr.f32.mxu0 %v2546_v0  ;;  %v945_v54 = vsel %vm299_vm2, %v941_v39, %v943_v44 }
 0xb14   :  { %2267 = vmatprep.subr.bf16.mxu0 %v2616_v9  ;;  %v947_v56 = vrot.slane %v945_v54, 4 }
 0xb17   :  { %2269 = vmatpush1.bf16.msra.mxu0 %v2620_v14 }
 0xb18   :  { %2271 = vmatprep.subr.bf16.mxu0 %v2626_v16 }
 0xb1b   :  { %2273 = vmatpush1.bf16.msra.mxu0 %v2638_v23 }
 0xb1c   :  { %2275 = vmatprep.subr.bf16.mxu0 %v2642_v24 }
 0xb1f   :  { %2277 = vmatpush1.bf16.msra.mxu0 %v2646_v27 }
 0xb20   :  { %2300 = vmatprep.subr.bf16.mxu0 %v2550_v13 }
 0xb22   :  { %2020 = vmatmul.mubr.msk.f32.vlgmr.msra.gmra.mrb[10].mxu0 %vm195_vm3, %v947_v56 }
 0xb23   :  { %2302 = vmatpush3.bf16.msra.mxu0 %v2742_v15  ;;  %2144 = vmatprep.mubr.msk.f32.mxu0 %vm2551_vm4, %v2546_v0 }
 0xb24   :  { %2303 = vmatprep.subr.bf16.mxu0 %v2550_v13 }
 0xb27   :  { %2305 = vmatpush3.bf16.msra.mxu0 %v2756_v22 }
 0xb28   :  { %2307 = vmatprep.subr.bf16.mxu0 %v2612_v4 }
 0xbe5   :  { %v932_v59 = vpop.f32.mrb[8].mxu0 }
 0xbe6   :  { %v933_v60 = vadd.f32 %v2809_v48, %v932_v59  ;;  %v2124_v61 = vpop.f32.mrb[9].mxu0 }
 0xbe8   :  { %2429 = vtanh.f32 %v933_v60 }
 0xbf2   :  { %v2430_v28 = vpop.eup %2429 }
 0xbf3   :  { %v937_v63 = vsel %vm2813_vm7, %v2430_v28, %v933_v60 }
 0xbf4   :  { %938 = vst [vmem:[%s3079_s7 + $0x8] sm:$0xf] %v937_v63 }
 0xbf5   :  { %v1016_v1 = vpop.f32.mrb[10].mxu0 }
 0xbf6   :  { %v1017_v2 = vadd.f32 %v1016_v1, %v2663_v34  ;;  %v1018_v3 = vpop.f32.mrb[11].mxu0 }
 0xbf7   :  { %v1019_v5 = vadd.f32 %v1018_v3, %v2703_v62 }
 0xbf8   :  { %1029 = vrot.lane.b32.xlu1 %v1017_v2, %s2547_s25  ;;  %v1021_v7 = vadd.f32 %v1017_v2, %v2879_v6 }
 0xbf9   :  { %1056 = vrot.lane.b32.xlu0 %v1019_v5, %s2549_s0  ;;  %v2022_v11 = vmul.f32 -1.442695, %v1019_v5 }
 0xbfa   :  { %v2021_v10 = vmul.f32 -1.442695, %v1021_v7 }
 0xbfc   :  { %2431 = vpow2.f32 %v2021_v10 }
 0xbfd   :  { %2433 = vpow2.f32 %v2022_v11 }
 0xc06   :  { %v2432_v29 = vpop.eup %2431 }
 0xc07   :  { %v2434_v12 = vpop.eup %2433  ;;  %v1025_v17 = vadd.f32 1.0, %v2432_v29 }
 0xc08   :  { %v1052_v18 = vadd.f32 1.0, %v2434_v12 }
 0xc09   :  { %2435 = vrcp.f32 %v1025_v17 }
 0xc0a   :  { %2437 = vrcp.f32 %v1052_v18 }
 0xc13   :  { %v2436_v19 = vpop.eup %2435 }
 0xc14   :  { %v2438_v21 = vpop.eup %2437  ;;  %v1039_v40 = vsub.f32 1.0, %v2436_v19  ;;  %v1047_v42 = vmul.f32 %v2436_v19, %v1045_v37 }
 0xc15   :  { %v1066_v43 = vsub.f32 1.0, %v2438_v21  ;;  %v1072_v47 = vmul.f32 %v2438_v21, %v2840_v55 }
 0xc6a   :  { %v1030_v20 = vpop.permute.xlu1 %1029 }
 0xc6b   :  { %v1032_v25 = vmul.f32 %v2436_v19, %v1030_v20  ;;  %v1057_v26 = vpop.permute.xlu0 %1056 }
 0xc6c   :  { %v1059_v30 = vmul.f32 %v2438_v21, %v1057_v26 }
 0xc6d   :  { %1034 = vrot.lane.b32.xlu1 %v1032_v25, %s2547_s25 }
 0xc6e   :  { %1061 = vrot.lane.b32.xlu0 %v1059_v30, %s2547_s25 }
 0xcdf   :  { %v1035_v58 = vpop.permute.xlu1 %1034 }
 0xce0   :  { %v1037_v31 = vadd.f32 %v1035_v58, %v2879_v6  ;;  %v1062_v32 = vpop.permute.xlu0 %1061 }
 0xce1   :  { %v1064_v33 = vadd.f32 %v1062_v32, %v1019_v5 }
 0xce2   :  { %2439 = vtanh.f32 %v1037_v31 }
 0xce3   :  { %2441 = vtanh.f32 %v1064_v33 }
 0xcec   :  { %v2440_v35 = vpop.eup %2439 }
 0xced   :  { %v2442_v36 = vpop.eup %2441  ;;  %1041 = vrot.lane.b32.xlu1 %v2440_v35, %s2548_s30 }
 0xcee   :  { %1068 = vrot.lane.b32.xlu0 %v2442_v36, %s2548_s30 }
 0xd5f   :  { %v1042_v41 = vpop.permute.xlu1 %1041 }
 0xd60   :  { %v1044_v45 = vmul.f32 %v1042_v41, %v1039_v40  ;;  %v1069_v46 = vpop.permute.xlu0 %1068 }
 0xd61   :  { %v1071_v49 = vmul.f32 %v1069_v46, %v1066_v43 }
 0xd62   :  { %v2889_v50 = vadd.f32 %v1047_v42, %v1044_v45 }
 0xd63   :  { %v2891_v52 = vadd.f32 %v1072_v47, %v1071_v49 }
 0xd64   :  { %1153 = vrot.lane.b32.xlu1 %v2889_v50, %s2548_s30  ;;  %v1257_v36 = vrot.slane %v2889_v50, 4 }
 0xd65   :  { %1075 = vrot.lane.b32.xlu0 %v2891_v52, %s2548_s30 }
 0xdd6   :  { %v1154_v55 = vpop.permute.xlu1 %1153 }
 0xdd7   :  { %v1076_v51 = vpop.permute.xlu0 %1075  ;;  %v1156_v39 = vsel %vm299_vm2, %v1154_v55, %v2891_v52 }
 0xdd8   :  { %2134 = vmatmul.mubr.msk.f32.vlgmr.msra.gmra.mrb[8].mxu1 %vm299_vm2, %v1076_v51 }
 0xdd9   :  { %2287 = vmatpush1.bf16.msra.mxu1 %v2614_v8  ;;  %1224 = vmatprep.mubr.f32.mxu1 %v2546_v0 }
 0xdda   :  { %2289 = vmatprep.subr.bf16.mxu1 %v2616_v9 }
 0xddd   :  { %2291 = vmatpush1.bf16.msra.mxu1 %v2620_v14 }
 0xdde   :  { %2293 = vmatprep.subr.bf16.mxu1 %v2626_v16 }
 0xde1   :  { %2295 = vmatpush1.bf16.msra.mxu1 %v2638_v23 }
 0xde2   :  { %2297 = vmatprep.subr.bf16.mxu1 %v2642_v24 }
 0xde5   :  { %2299 = vmatpush1.bf16.msra.mxu1 %v2646_v27 }
 0xde6   :  { %2322 = vmatprep.subr.bf16.mxu1 %v2550_v13 }
 0xde8   :  { %2024 = vmatmul.mubr.msk.f32.vlgmr.msra.gmra.mrb[10].mxu1 %vm195_vm3, %v1156_v39 }
 0xde9   :  { %2324 = vmatpush3.bf16.msra.mxu1 %v2742_v15  ;;  %2155 = vmatprep.mubr.msk.f32.mxu1 %vm2551_vm4, %v2546_v0 }
 0xdea   :  { %2325 = vmatprep.subr.bf16.mxu1 %v2550_v13 }
 0xded   :  { %2327 = vmatpush3.bf16.msra.mxu1 %v2756_v22 }
 0xdee   :  { %2329 = vmatprep.subr.bf16.mxu1 %v2612_v4 }
 0xeab   :  { %v1145_v44 = vpop.f32.mrb[8].mxu1 }
 0xeac   :  { %v1146_v54 = vadd.f32 %v2809_v48, %v1145_v44  ;;  %v2135_v56 = vpop.f32.mrb[9].mxu1 }
 0xeae   :  { %2443 = vtanh.f32 %v1146_v54 }
 0xeb8   :  { %v2444_v59 = vpop.eup %2443 }
 0xeb9   :  { %v1150_v60 = vsel %vm2813_vm7, %v2444_v59, %v1146_v54 }
 0xeba   :  { %1151 = vst [vmem:[%s3079_s7 + $0xc] sm:$0xf] %v1150_v60 }
 0xebb   :  { %v1226_v61 = vpop.f32.mrb[10].mxu1 }
 0xebc   :  { %v1227_v28 = vadd.f32 %v1226_v61, %v2663_v34  ;;  %v1228_v63 = vpop.f32.mrb[11].mxu1 }
 0xebd   :  { %v1229_v1 = vadd.f32 %v1228_v63, %v2703_v62 }
 0xebe   :  { %v1232_v2 = vrot.slane %v1227_v28, 4 }
 0xebf   :  { %1268 = vrot.lane.b32.xlu0 %v1229_v1, %s2549_s0  ;;  %v2026_v5 = vmul.f32 -1.442695, %v1229_v1 }
 0xec0   :  { %1241 = vrot.lane.b32.xlu1 %v1232_v2, %s2547_s25  ;;  %v1234_v3 = vadd.f32 %v1232_v2, %v2879_v6 }
 0xec1   :  { %2445 = vpow2.f32 %v2026_v5 }
 0xec2   :  { %v2025_v7 = vmul.f32 -1.442695, %v1234_v3 }
 0xec4   :  { %2447 = vpow2.f32 %v2025_v7 }
 0xecb   :  { %v2446_v10 = vpop.eup %2445 }
 0xecc   :  { %v1264_v29 = vadd.f32 1.0, %v2446_v10 }
 0xece   :  { %v2448_v11 = vpop.eup %2447  ;;  %2449 = vrcp.f32 %v1264_v29 }
 0xecf   :  { %v1238_v12 = vadd.f32 1.0, %v2448_v11 }
 0xed1   :  { %2451 = vrcp.f32 %v1238_v12 }
 0xed8   :  { %v2450_v17 = vpop.eup %2449 }
 0xed9   :  { %v1278_v35 = vsub.f32 1.0, %v2450_v17  ;;  %v1284_v41 = vmul.f32 %v2450_v17, %v2891_v52 }
 0xedb   :  { %v2452_v19 = vpop.eup %2451 }
 0xedc   :  { %v1251_v40 = vsub.f32 1.0, %v2452_v19  ;;  %v1259_v46 = vmul.f32 %v2452_v19, %v1257_v36 }
 0xf31   :  { %v1269_v18 = vpop.permute.xlu0 %1268 }
 0xf32   :  { %v1271_v20 = vmul.f32 %v2450_v17, %v1269_v18  ;;  %v1242_v21 = vpop.permute.xlu1 %1241 }
 0xf33   :  { %v1244_v25 = vmul.f32 %v2452_v19, %v1242_v21 }
 0xf34   :  { %1273 = vrot.lane.b32.xlu0 %v1271_v20, %s2547_s25 }
 0xf35   :  { %1246 = vrot.lane.b32.xlu1 %v1244_v25, %s2547_s25 }
 0xfa6   :  { %v1274_v26 = vpop.permute.xlu0 %1273 }
 0xfa7   :  { %v1276_v30 = vadd.f32 %v1274_v26, %v1229_v1  ;;  %v1247_v58 = vpop.permute.xlu1 %1246 }
 0xfa8   :  { %v1249_v31 = vadd.f32 %v1247_v58, %v2879_v6 }
 0xfa9   :  { %2453 = vtanh.f32 %v1276_v30 }
 0xfaa   :  { %2455 = vtanh.f32 %v1249_v31 }
 0xfb3   :  { %v2454_v32 = vpop.eup %2453 }
 0xfb4   :  { %v2456_v33 = vpop.eup %2455  ;;  %1280 = vrot.lane.b32.xlu0 %v2454_v32, %s2548_s30 }
 0xfb5   :  { %1253 = vrot.lane.b32.xlu1 %v2456_v33, %s2548_s30 }
0x1026   :  { %v1281_v37 = vpop.permute.xlu0 %1280 }
0x1027   :  { %v1283_v43 = vmul.f32 %v1281_v37, %v1278_v35  ;;  %v1254_v45 = vpop.permute.xlu1 %1253 }
0x1028   :  { %v1256_v42 = vmul.f32 %v1254_v45, %v1251_v40 }
0x1029   :  { %v2934_v6 = vadd.f32 %v1284_v41, %v1283_v43 }
0x102a   :  { %v2936_v47 = vadd.f32 %v1259_v46, %v1256_v42 }
0x102b   :  { %1287 = vrot.lane.b32.xlu0 %v2934_v6, %s2548_s30  ;;  %v1368_v52 = vrot.slane %v2934_v6, 4 }
0x102c   :  { %1365 = vrot.lane.b32.xlu1 %v2936_v47, %s2548_s30  ;;  %v1470_v58 = vrot.slane %v2936_v47, 4 }
0x109d   :  { %v1288_v49 = vpop.permute.xlu0 %1287 }
0x109e   :  { %2145 = vmatmul.mubr.msk.f32.vlgmr.msra.gmra.mrb[12].mxu0 %vm299_vm2, %v1288_v49  ;;  %v1366_v50 = vpop.permute.xlu1 %1365 }
0x109f   :  { %2309 = vmatpush1.bf16.msra.mxu0 %v2614_v8  ;;  %1439 = vmatprep.mubr.f32.mxu0 %v2546_v0  ;;  %v1370_v51 = vsel %vm299_vm2, %v1366_v50, %v1368_v52 }
0x10a0   :  { %2311 = vmatprep.subr.bf16.mxu0 %v2616_v9  ;;  %v1372_v55 = vrot.slane %v1370_v51, 4 }
0x10a3   :  { %2313 = vmatpush1.bf16.msra.mxu0 %v2620_v14 }
0x10a4   :  { %2315 = vmatprep.subr.bf16.mxu0 %v2626_v16 }
0x10a7   :  { %2317 = vmatpush1.bf16.msra.mxu0 %v2638_v23 }
0x10a8   :  { %2319 = vmatprep.subr.bf16.mxu0 %v2642_v24 }
0x10ab   :  { %2321 = vmatpush1.bf16.msra.mxu0 %v2646_v27 }
0x10ac   :  { %2344 = vmatprep.subr.bf16.mxu0 %v2550_v13 }
0x10ae   :  { %2028 = vmatmul.mubr.msk.f32.vlgmr.msra.gmra.mrb[14].mxu0 %vm195_vm3, %v1372_v55 }
0x10af   :  { %2346 = vmatpush3.bf16.msra.mxu0 %v2742_v15  ;;  %2166 = vmatprep.mubr.msk.f32.mxu0 %vm2551_vm4, %v2546_v0 }
0x10b0   :  { %2347 = vmatprep.subr.bf16.mxu0 %v2550_v13 }
0x10b3   :  { %2349 = vmatpush3.bf16.msra.mxu0 %v2756_v22 }
0x10b4   :  { %2351 = vmatprep.subr.bf16.mxu0 %v2612_v4  ;;  %v2973_v4 = vadd.f32 %v2689_v57, %v2670_v38 }
0x1171   :  { %v1357_v39 = vpop.f32.mrb[12].mxu0 }
0x1172   :  { %v1358_v44 = vadd.f32 %v2809_v48, %v1357_v39  ;;  %v2146_v54 = vpop.f32.mrb[13].mxu0 }
0x1174   :  { %2457 = vtanh.f32 %v1358_v44 }
0x117e   :  { %v2458_v56 = vpop.eup %2457 }
0x117f   :  { %v1362_v59 = vsel %vm2813_vm7, %v2458_v56, %v1358_v44 }
0x1180   :  { %1363 = vst [vmem:[%s3079_s7 + $0x10] sm:$0xf] %v1362_v59 }
0x1181   :  { %v1441_v60 = vpop.f32.mrb[14].mxu0 }
0x1182   :  { %v1442_v61 = vadd.f32 %v1441_v60, %v2663_v34  ;;  %v1443_v28 = vpop.f32.mrb[15].mxu0 }
0x1183   :  { %v1444_v63 = vadd.f32 %v1443_v28, %v2703_v62 }
0x1184   :  { %1454 = vrot.lane.b32.xlu1 %v1442_v61, %s2547_s25  ;;  %v1446_v1 = vadd.f32 %v1442_v61, %v2973_v4 }
0x1185   :  { %1481 = vrot.lane.b32.xlu0 %v1444_v63, %s2549_s0  ;;  %v2030_v3 = vmul.f32 -1.442695, %v1444_v63 }
0x1186   :  { %v2029_v2 = vmul.f32 -1.442695, %v1446_v1 }
0x1188   :  { %2459 = vpow2.f32 %v2029_v2 }
0x1189   :  { %2461 = vpow2.f32 %v2030_v3 }
0x1192   :  { %v2460_v5 = vpop.eup %2459 }
0x1193   :  { %v2462_v7 = vpop.eup %2461  ;;  %v1450_v10 = vadd.f32 1.0, %v2460_v5 }
0x1194   :  { %v1477_v11 = vadd.f32 1.0, %v2462_v7 }
0x1195   :  { %2463 = vrcp.f32 %v1450_v10 }
0x1196   :  { %2465 = vrcp.f32 %v1477_v11 }
0x119f   :  { %v2464_v29 = vpop.eup %2463 }
0x11a0   :  { %v2466_v17 = vpop.eup %2465  ;;  %v1464_v31 = vsub.f32 1.0, %v2464_v29  ;;  %v1472_v36 = vmul.f32 %v2464_v29, %v1470_v58 }
0x11a1   :  { %v1491_v33 = vsub.f32 1.0, %v2466_v17  ;;  %v1497_v40 = vmul.f32 %v2466_v17, %v2934_v6 }
0x11f6   :  { %v1455_v12 = vpop.permute.xlu1 %1454 }
0x11f7   :  { %v1457_v18 = vmul.f32 %v2464_v29, %v1455_v12  ;;  %v1482_v19 = vpop.permute.xlu0 %1481 }
0x11f8   :  { %v1484_v20 = vmul.f32 %v2466_v17, %v1482_v19 }
0x11f9   :  { %1459 = vrot.lane.b32.xlu1 %v1457_v18, %s2547_s25 }
0x11fa   :  { %1486 = vrot.lane.b32.xlu0 %v1484_v20, %s2547_s25 }
0x126b   :  { %v1460_v38 = vpop.permute.xlu1 %1459 }
0x126c   :  { %v1462_v57 = vadd.f32 %v1460_v38, %v2973_v4  ;;  %v1487_v21 = vpop.permute.xlu0 %1486 }
0x126d   :  { %v1489_v25 = vadd.f32 %v1487_v21, %v1444_v63 }
0x126e   :  { %2467 = vtanh.f32 %v1462_v57 }
0x126f   :  { %2469 = vtanh.f32 %v1489_v25 }
0x1278   :  { %v2468_v26 = vpop.eup %2467 }
0x1279   :  { %v2470_v30 = vpop.eup %2469  ;;  %1466 = vrot.lane.b32.xlu1 %v2468_v26, %s2548_s30 }
0x127a   :  { %1493 = vrot.lane.b32.xlu0 %v2470_v30, %s2548_s30 }
0x12eb   :  { %v1467_v32 = vpop.permute.xlu1 %1466 }
0x12ec   :  { %v1469_v35 = vmul.f32 %v1467_v32, %v1464_v31  ;;  %v1494_v37 = vpop.permute.xlu0 %1493 }
0x12ed   :  { %v1496_v41 = vmul.f32 %v1494_v37, %v1491_v33 }
0x12ee   :  { %v2983_v43 = vadd.f32 %v1472_v36, %v1469_v35 }
0x12ef   :  { %v2985_v45 = vadd.f32 %v1497_v40, %v1496_v41 }
0x12f0   :  { %1578 = vrot.lane.b32.xlu1 %v2983_v43, %s2548_s30  ;;  %v1682_v19 = vrot.slane %v2983_v43, 4 }
0x12f1   :  { %1500 = vrot.lane.b32.xlu0 %v2985_v45, %s2548_s30 }
0x1362   :  { %v1579_v46 = vpop.permute.xlu1 %1578 }
0x1363   :  { %v1501_v42 = vpop.permute.xlu0 %1500  ;;  %v1581_v6 = vsel %vm299_vm2, %v1579_v46, %v2985_v45 }
0x1364   :  { %2156 = vmatmul.mubr.msk.f32.vlgmr.msra.gmra.mrb[12].mxu1 %vm299_vm2, %v1501_v42 }
0x1365   :  { %2331 = vmatpush1.bf16.msra.mxu1 %v2614_v8  ;;  %1649 = vmatprep.mubr.f32.mxu1 %v2546_v0 }
0x1366   :  { %2333 = vmatprep.subr.bf16.mxu1 %v2616_v9 }
0x1369   :  { %2335 = vmatpush1.bf16.msra.mxu1 %v2620_v14 }
0x136a   :  { %2337 = vmatprep.subr.bf16.mxu1 %v2626_v16 }
0x136d   :  { %2339 = vmatpush1.bf16.msra.mxu1 %v2638_v23 }
0x136e   :  { %2341 = vmatprep.subr.bf16.mxu1 %v2642_v24 }
0x1371   :  { %2343 = vmatpush1.bf16.msra.mxu1 %v2646_v27 }
0x1372   :  { %2366 = vmatprep.subr.bf16.mxu1 %v2550_v13 }
0x1374   :  { %2032 = vmatmul.mubr.msk.f32.vlgmr.msra.gmra.mrb[14].mxu1 %vm195_vm3, %v1581_v6 }
0x1375   :  { %2368 = vmatpush3.bf16.msra.mxu1 %v2742_v15  ;;  %2177 = vmatprep.mubr.msk.f32.mxu1 %vm2551_vm4, %v2546_v0 }
0x1376   :  { %2369 = vmatprep.subr.bf16.mxu1 %v2550_v13 }
0x1379   :  { %2371 = vmatpush3.bf16.msra.mxu1 %v2756_v22 }
0x1437   :  { %v1570_v47 = vpop.f32.mrb[12].mxu1 }
0x1438   :  { %v1571_v49 = vadd.f32 %v2809_v48, %v1570_v47  ;;  %v2157_v50 = vpop.f32.mrb[13].mxu1 }
0x143a   :  { %2471 = vtanh.f32 %v1571_v49 }
0x1444   :  { %v2472_v52 = vpop.eup %2471 }
0x1445   :  { %v1575_v51 = vsel %vm2813_vm7, %v2472_v52, %v1571_v49 }
0x1446   :  { %1576 = vst [vmem:[%s3079_s7 + $0x14] sm:$0xf] %v1575_v51 }
0x1447   :  { %v1651_v15 = vpop.f32.mrb[14].mxu1 }
0x1448   :  { %v1652_v55 = vadd.f32 %v1651_v15, %v2663_v34  ;;  %v1653_v39 = vpop.f32.mrb[15].mxu1 }
0x1449   :  { %v1654_v13 = vadd.f32 %v1653_v39, %v2703_v62 }
0x144a   :  { %v1657_v22 = vrot.slane %v1652_v55, 4 }
0x144b   :  { %1693 = vrot.lane.b32.xlu0 %v1654_v13, %s2549_s0  ;;  %v2034_v54 = vmul.f32 -1.442695, %v1654_v13 }
0x144c   :  { %1666 = vrot.lane.b32.xlu1 %v1657_v22, %s2547_s25  ;;  %v1659_v44 = vadd.f32 %v1657_v22, %v2973_v4 }
0x144d   :  { %2473 = vpow2.f32 %v2034_v54 }
0x144e   :  { %v2033_v56 = vmul.f32 -1.442695, %v1659_v44 }
0x1450   :  { %2475 = vpow2.f32 %v2033_v56 }
0x1457   :  { %v2474_v59 = vpop.eup %2473 }
0x1458   :  { %v1689_v61 = vadd.f32 1.0, %v2474_v59 }
0x145a   :  { %v2476_v60 = vpop.eup %2475  ;;  %2477 = vrcp.f32 %v1689_v61 }
0x145b   :  { %v1663_v28 = vadd.f32 1.0, %v2476_v60 }
0x145d   :  { %2479 = vrcp.f32 %v1663_v28 }
0x1464   :  { %v2478_v34 = vpop.eup %2477 }
0x1465   :  { %v1703_v18 = vsub.f32 1.0, %v2478_v34  ;;  %v1709_v57 = vmul.f32 %v2478_v34, %v2985_v45 }
0x1467   :  { %v2480_v1 = vpop.eup %2479 }
0x1468   :  { %v1676_v38 = vsub.f32 1.0, %v2480_v1  ;;  %v1684_v30 = vmul.f32 %v2480_v1, %v1682_v19 }
0x14bd   :  { %v1694_v63 = vpop.permute.xlu0 %1693 }
0x14be   :  { %v1696_v2 = vmul.f32 %v2478_v34, %v1694_v63  ;;  %v1667_v3 = vpop.permute.xlu1 %1666 }
0x14bf   :  { %v1669_v5 = vmul.f32 %v2480_v1, %v1667_v3 }
0x14c0   :  { %1698 = vrot.lane.b32.xlu0 %v1696_v2, %s2547_s25 }
0x14c1   :  { %1671 = vrot.lane.b32.xlu1 %v1669_v5, %s2547_s25 }
0x1532   :  { %v1699_v7 = vpop.permute.xlu0 %1698 }
0x1533   :  { %v1701_v10 = vadd.f32 %v1699_v7, %v1654_v13  ;;  %v1672_v11 = vpop.permute.xlu1 %1671 }
0x1534   :  { %v1674_v29 = vadd.f32 %v1672_v11, %v2973_v4 }
0x1535   :  { %2481 = vtanh.f32 %v1701_v10 }
0x1536   :  { %2483 = vtanh.f32 %v1674_v29 }
0x153f   :  { %v2482_v12 = vpop.eup %2481 }
0x1540   :  { %v2484_v17 = vpop.eup %2483  ;;  %1705 = vrot.lane.b32.xlu0 %v2482_v12, %s2548_s30 }
0x1541   :  { %1678 = vrot.lane.b32.xlu1 %v2484_v17, %s2548_s30 }
0x15b2   :  { %v1706_v20 = vpop.permute.xlu0 %1705 }
0x15b3   :  { %v1708_v21 = vmul.f32 %v1706_v20, %v1703_v18  ;;  %v1679_v25 = vpop.permute.xlu1 %1678 }
0x15b4   :  { %v1681_v26 = vmul.f32 %v1679_v25, %v1676_v38 }
0x15b5   :  { %v1710_v4 = vadd.f32 %v1709_v57, %v1708_v21 }
0x15b6   :  { %v1685_v58 = vadd.f32 %v1684_v30, %v1681_v26 }
0x15b7   :  { %1712 = vrot.lane.b32.xlu0 %v1710_v4, %s2548_s30  ;;  %v1793_v33 = vrot.slane %v1710_v4, 4 }
0x15b8   :  { %1790 = vrot.lane.b32.xlu1 %v1685_v58, %s2548_s30 }
0x1629   :  { %v1713_v31 = vpop.permute.xlu0 %1712 }
0x162a   :  { %2167 = vmatmul.mubr.msk.f32.vlgmr.msra.gmra.mrb[16].mxu0 %vm299_vm2, %v1713_v31  ;;  %v1791_v32 = vpop.permute.xlu1 %1790 }
0x162b   :  { %2353 = vmatpush1.bf16.msra.mxu0 %v2614_v8  ;;  %1974 = vst.msk [vmem:[#allocation5 - $0x4] sm:$0xf0] %vm1973_vm8, %v1791_v32  ;;  %1864 = vmatprep.mubr.f32.mxu0 %v2546_v0  ;;  %v1795_v35 = vsel %vm299_vm2, %v1791_v32, %v1793_v33 }
0x162c   :  { %2355 = vmatprep.subr.bf16.mxu0 %v2616_v9  ;;  %v1797_v36 = vrot.slane %v1795_v35, 4 }
0x162f   :  { %2357 = vmatpush1.bf16.msra.mxu0 %v2620_v14 }
0x1630   :  { %2359 = vmatprep.subr.bf16.mxu0 %v2626_v16 }
0x1633   :  { %2361 = vmatpush1.bf16.msra.mxu0 %v2638_v23 }
0x1634   :  { %2363 = vmatprep.subr.bf16.mxu0 %v2642_v24 }
0x1637   :  { %2365 = vmatpush1.bf16.msra.mxu0 %v2646_v27 }
0x163a   :  { %2036 = vmatmul.mubr.msk.f32.vlgmr.msra.gmra.mrb[18].mxu0 %vm195_vm3, %v1797_v36 }
0x16fd   :  { %v1782_v8 = vpop.f32.mrb[16].mxu0 }
0x16fe   :  { %v1783_v0 = vadd.f32 %v2809_v48, %v1782_v8  ;;  %v2168_v9 = vpop.f32.mrb[17].mxu0 }
0x1700   :  { %2485 = vtanh.f32 %v1783_v0 }
0x170a   :  { %v2486_v14 = vpop.eup %2485 }
0x170b   :  { %v1787_v16 = vsel %vm2813_vm7, %v2486_v14, %v1783_v0 }
0x170c   :  { %1788 = vst [vmem:[%s3079_s7 + $0x18] sm:$0xf] %v1787_v16 }
0x170d   :  { %v1866_v23 = vpop.f32.mrb[18].mxu0 }
0x170e   :  { %v1867_v24 = vpop.f32.mrb[19].mxu0 }
0x170f   :  { %v1868_v27 = vadd.f32 %v1867_v24, %v2703_v62 }
0x1711   :  { %1877 = vrot.lane.b32.xlu0 %v1868_v27, %s2549_s0  ;;  %v2037_v37 = vmul.f32 -1.442695, %v1868_v27  ;;  %s2517_s0 = scalar_lea.vmem %s1987_s29, 128 }
0x1712   :  { %p2518_p8 = scmp.ne.s32.totalorder %s1987_s29, %s2517_s0  ;;  %p2523_p10 = scmp.lt.s32.totalorder %s2517_s0, %s2517_s0 }
0x1713   :  { %2487 = vpow2.f32 %v2037_v37 }
0x1714   :  { %p2524_p11 = por %p2523_p10, %p2522_p9 }
0x1716   :  { %p2525_p12 = pnand %p2524_p11, %p2518_p8 }
0x171d   :  { %v2488_v40 = vpop.eup %2487 }
0x171e   :  { %v1873_v41 = vadd.f32 1.0, %v2488_v40 }
0x1720   :  { %2489 = vrcp.f32 %v1873_v41 }
0x172a   :  { %v2490_v43 = vpop.eup %2489 }
0x172b   :  { %v1887_v49 = vsub.f32 1.0, %v2490_v43  ;;  %v1893_v50 = vmul.f32 %v2490_v43, %v1710_v4 }
0x1783   :  { %v1878_v45 = vpop.permute.xlu0 %1877 }
0x1784   :  { %v1880_v42 = vmul.f32 %v2490_v43, %v1878_v45 }
0x1786   :  { %1882 = vrot.lane.b32.xlu1 %v1880_v42, %s2547_s25 }
0x17f8   :  { %v1883_v46 = vpop.permute.xlu1 %1882 }
0x17f9   :  { %v1885_v6 = vadd.f32 %v1883_v46, %v1868_v27 }
0x17fb   :  { %2491 = vtanh.f32 %v1885_v6 }
0x1805   :  { %v2492_v47 = vpop.eup %2491 }
0x1806   :  { %1889 = vrot.lane.b32.xlu0 %v2492_v47, %s2548_s30 }
0x1878   :  { %v1890_v62 = vpop.permute.xlu0 %1889 }
0x1879   :  { %v1892_v52 = vmul.f32 %v1890_v62, %v1887_v49 }
0x187b   :  { %v1894_v51 = vadd.f32 %v1893_v50, %v1892_v52 }
0x187d   :  { %1896 = vrot.lane.b32.xlu1 %v1894_v51, %s2548_s30 }
0x18ef   :  { %v1897_v15 = vpop.permute.xlu1 %1896 }
0x18f0   :  { %1978 = vst.msk [vmem:[#allocation5 + $0x4] sm:$0xf] %vm1977_vm9, %v1897_v15  ;;  %2178 = vmatmul.mubr.msk.f32.vlgmr.msra.gmra.mrb[16].mxu1 %vm299_vm2, %v1897_v15 }
0x18f1   :  { %2528 = shalt.err (!%p2525_p12)
}
0x18f2   :  { %s2529_s11 = scalar_lea.hbm %s3080_s8, 128 }
0x18f3   :  { %p2530_p13 = scmp.ne.s32.totalorder %s3080_s8, %s2529_s11  ;;  %p2533_p0 = scmp.lt.u32.totalorder %s2529_s11, %s3080_s8 }
0x18f5   :  { %p2535_p1 = pnand %p2533_p0, %p2530_p13 }
0x18f7   :  { %2538 = shalt.err (!%p2535_p1)
}
0x18f8   :  { %s2553_s15 = smov 4  }
0x18f9   :  { %1992 = dma.vmem_to_hbm [thread:$0]  %s1987_s29, 128, %s3080_s8, [#allocation4], %s2547_s25, %s2547_s25, %s2553_s15  }
0x19c3   :  { %v1966_v55 = vpop.f32.mrb[16].mxu1 }
0x19c4   :  { %v1967_v39 = vadd.f32 %v2809_v48, %v1966_v55  ;;  %v2179_v13 = vpop.f32.mrb[17].mxu1 }
0x19c6   :  { %2493 = vtanh.f32 %v1967_v39 }
0x19d0   :  { %v2494_v22 = vpop.eup %2493 }
0x19d1   :  { %v1971_v44 = vsel %vm2813_vm7, %v2494_v22, %v1967_v39 }
0x19d2   :  { %1972 = vst [vmem:[%s3079_s7 + $0x1c] sm:$0xf] %v1971_v44 }
0x19d3   :  { %2541 = dma.done.wait [#allocation4], 128  }
0x19d4   :  { %2542 = vsyncadd [#allocation4], 4294967168 }
0x19d5   :  { %1998 = vsyncpa [#allocation3], 1 }
0x19d6   :  { %1999 = vsyncpa [#allocation4], 1 }

</bundles_post_ra>
